<compile_context>
chip_gen: v7x
topology: tpu7x:2x2x1
jax: 0.10.0
libtpu: 0.0.40
codegen_flags: <defaults>
</compile_context>

<pallas_src>
import jax
import jax.numpy as jnp
from jax.experimental import pallas as pl
from jax.experimental.pallas import tpu as pltpu


# ---------------------------------------------------------------------------
# Fused kernel
# ---------------------------------------------------------------------------

def _make_fused_kernel(*, expand, use_res, stride, th_out, H, W, Wo, hidden):
    """Builds the fused kernel for one (batch, row-tile) grid step."""
    th_in = (th_out - 1) * stride + 3     # hidden rows (incl. 3x3 halo) per tile
    Wp = W + 2

    def dsl(start, size):
        # contiguous for stride 1; strided slice for stride 2
        return pl.ds(start, size) if stride == 1 else pl.ds(start, size, stride=stride)

    def kernel(*refs):
        if expand:
            (xp_ref, we_ref, be_ref, wd_ref, bd_ref, wp_ref, bp_ref,
             o_ref, hid_ref) = refs
        else:
            xp_ref, wd_ref, bd_ref, wp_ref, bp_ref, o_ref, hid_ref = refs
            we_ref = be_ref = None

        t = pl.program_id(1)
        rb = t * (th_out * stride)        # first padded-hidden row needed by this tile

        # zero-halo mask for the depthwise input (cols 0 and W+1 are padding)
        col = jax.lax.broadcasted_iota(jnp.int32, (Wp, 1), 0)
        col_ok = jnp.logical_and(col >= 1, col <= W)

        # -------- stage 1: expand 1x1 (+BN+ReLU6), written to VMEM scratch ------
        for j in range(th_in):
            prow = rb + j                                  # padded-row coordinate
            x_row = xp_ref[prow].astype(jnp.float32)       # (Wp, Cin)
            if expand:
                h_row = jnp.dot(x_row, we_ref[...],
                                preferred_element_type=jnp.float32)
                h_row = jnp.clip(h_row + be_ref[...], 0.0, 6.0)
            else:
                h_row = x_row                              # expand_ratio == 1
            row_ok = jnp.logical_and(prow >= 1, prow <= H)
            h_row = jnp.where(jnp.logical_and(row_ok, col_ok), h_row, 0.0)
            hid_ref[j] = h_row                             # (Wp, hidden)

        # -------- stage 2: depthwise 3x3 (+BN shift + ReLU6), whole tile --------
        acc = jnp.zeros((th_out, Wo, hidden), jnp.float32)
        for kh in range(3):
            for kw in range(3):
                patch = hid_ref[dsl(kh, th_out), dsl(kw, Wo), :]
                tap = wd_ref[kh * 3 + kw: kh * 3 + kw + 1, :]     # (1, hidden)
                acc = acc + patch * tap
        y = jnp.clip(acc + bd_ref[...], 0.0, 6.0)

        # -------- stage 3: project 1x1 (+BN shift) and optional residual --------
        wp = wp_ref[...]
        bp = bp_ref[...]
        for i in range(th_out):
            o_row = jnp.dot(y[i], wp, preferred_element_type=jnp.float32) + bp
            if use_res:     # stride == 1 and inp == oup  ->  Wo == W, Cin == oup
                o_row = o_row + xp_ref[rb + 1 + i, pl.ds(1, W), :].astype(jnp.float32)
            o_ref[i] = o_row.astype(o_ref.dtype)

    return kernel, th_in


# ---------------------------------------------------------------------------
# pallas_call wrapper (NHWC core + NCHW torch-convention entry)
# ---------------------------------------------------------------------------

def _pick_row_tile(ho, max_rows=8):
    divisors = [d for d in range(1, ho + 1) if ho % d == 0 and d <= max_rows]
    multi = [d for d in divisors if ho // d >= 2]          # prefer >=2 grid steps
    return max(multi) if multi else max(divisors)


def _fold_bn(bn, eps=1e-5):
    scale = bn["gamma"] / jnp.sqrt(bn["var"] + eps)
    shift = bn["beta"] - bn["mean"] * scale
    return scale, shift


def _fold_params(p, expand):
    """Fold BN scale into conv weights; keep per-channel shifts for the epilogue."""
    fp = {}
    if expand:
        s1, b1 = _fold_bn(p["bn1"])
        fp["we"] = p["w_expand"] * s1[None, :]
        fp["be"] = b1[None, :]
    s2, b2 = _fold_bn(p["bn2"])
    hidden = p["w_dw"].shape[-1]
    fp["wd"] = (p["w_dw"] * s2[None, None, :]).reshape(9, hidden)
    fp["bd"] = b2[None, :]
    s3, b3 = _fold_bn(p["bn3"])
    fp["wp"] = p["w_proj"] * s3[None, :]
    fp["bp"] = b3[None, :]
    return fp


def inverted_residual_nhwc(x_nhwc, p, *, stride, expand_ratio):
    N, H, W, inp = x_nhwc.shape
    expand = expand_ratio != 1
    hidden = int(round(inp * expand_ratio))
    oup = p["w_proj"].shape[1]
    use_res = (stride == 1) and (inp == oup)

    Ho = (H - 1) // stride + 1
    Wo = (W - 1) // stride + 1
    th_out = _pick_row_tile(Ho)
    n_tiles = Ho // th_out

    kernel, th_in = _make_fused_kernel(
        expand=expand, use_res=use_res, stride=stride, th_out=th_out,
        H=H, W=W, Wo=Wo, hidden=hidden)

    fp = _fold_params(p, expand)

    # zero-pad only the small (Cin-channel) input; the hidden tensor never hits HBM
    xp = jnp.pad(x_nhwc, ((0, 0), (1, 1), (1, 1), (0, 0)))
    Hp, Wp = H + 2, W + 2

    def const_spec(shape):
        return pl.BlockSpec(shape, lambda n, t: (0,) * len(shape))

    in_specs = [pl.BlockSpec((None, Hp, Wp, inp), lambda n, t: (n, 0, 0, 0))]
    args = [xp]
    if expand:
        in_specs += [const_spec((inp, hidden)), const_spec((1, hidden))]
        args += [fp["we"], fp["be"]]
    in_specs += [const_spec((9, hidden)), const_spec((1, hidden)),
                 const_spec((hidden, oup)), const_spec((1, oup))]
    args += [fp["wd"], fp["bd"], fp["wp"], fp["bp"]]

    return pl.pallas_call(
        kernel,
        out_shape=jax.ShapeDtypeStruct((N, Ho, Wo, oup), x_nhwc.dtype),
        grid=(N, n_tiles),
        in_specs=in_specs,
        out_specs=pl.BlockSpec((None, th_out, Wo, oup), lambda n, t: (n, t, 0, 0)),
        scratch_shapes=[pltpu.VMEM((th_in, Wp, hidden), jnp.float32)],
        compiler_params=pltpu.CompilerParams(
            dimension_semantics=("parallel", "parallel"),
            vmem_limit_bytes=32 * 1024 * 1024),
    )(*args)


def inverted_residual(x_nchw, p, *, stride, expand_ratio):
    # torch-convention (NCHW) entry point; kernel work happens in NHWC.
    x = jnp.transpose(x_nchw, (0, 2, 3, 1))
    y = inverted_residual_nhwc(x, p, stride=stride, expand_ratio=expand_ratio)
    return jnp.transpose(y, (0, 3, 1, 2))


# ---------------------------------------------------------------------------
# Parameters (deterministic, synthetic) + pure-JAX reference
# ---------------------------------------------------------------------------

def make_params(key, inp, oup, expand_ratio):
    hidden = int(round(inp * expand_ratio))
    ks = jax.random.split(key, 6)

    def bn(k, c):
        k1, k2, k3, k4 = jax.random.split(k, 4)
        return {
            "gamma": 1.0 + 0.1 * jax.random.normal(k1, (c,), jnp.float32),
            "beta": 0.1 * jax.random.normal(k2, (c,), jnp.float32),
            "mean": 0.1 * jax.random.normal(k3, (c,), jnp.float32),
            "var": 0.5 + 0.5 * jax.random.uniform(k4, (c,), jnp.float32),
        }

    p = {}
    if expand_ratio != 1:
        # torch Conv2d(inp, hidden, 1) weight (hidden, inp, 1, 1) -> (inp, hidden)
        p["w_expand"] = 0.2 * jax.random.normal(ks[0], (inp, hidden), jnp.float32)
        p["bn1"] = bn(ks[1], hidden)
    # torch depthwise Conv2d weight (hidden, 1, 3, 3) -> (3, 3, hidden)
    p["w_dw"] = 0.2 * jax.random.normal(ks[2], (3, 3, hidden), jnp.float32)
    p["bn2"] = bn(ks[3], hidden)
    # torch Conv2d(hidden, oup, 1) weight (oup, hidden, 1, 1) -> (hidden, oup)
    p["w_proj"] = 0.2 * jax.random.normal(ks[4], (hidden, oup), jnp.float32)
    p["bn3"] = bn(ks[5], oup)
    return p


def ref_forward(x_nchw, p, stride, expand_ratio):
    dn = ("NHWC", "HWIO", "NHWC")
    eps = 1e-5

    def bn_apply(h, bn):
        return (h - bn["mean"]) / jnp.sqrt(bn["var"] + eps) * bn["gamma"] + bn["beta"]

    x = jnp.transpose(x_nchw, (0, 2, 3, 1))
    h = x
    if expand_ratio != 1:
        w = p["w_expand"].reshape(1, 1, *p["w_expand"].shape)
        h = jax.lax.conv_general_dilated(h, w, (1, 1), "VALID", dimension_numbers=dn)
        h = jnp.clip(bn_apply(h, p["bn1"]), 0.0, 6.0)
    hidden = h.shape[-1]
    wd = p["w_dw"].reshape(3, 3, 1, hidden)
    h = jax.lax.conv_general_dilated(h, wd, (stride, stride), [(1, 1), (1, 1)],
                                     dimension_numbers=dn, feature_group_count=hidden)
    h = jnp.clip(bn_apply(h, p["bn2"]), 0.0, 6.0)
    wp = p["w_proj"].reshape(1, 1, *p["w_proj"].shape)
    h = jax.lax.conv_general_dilated(h, wp, (1, 1), "VALID", dimension_numbers=dn)
    h = bn_apply(h, p["bn3"])
    if stride == 1 and x_nchw.shape[1] == h.shape[-1]:
        h = h + x
    return jnp.transpose(h, (0, 3, 1, 2))


# ---------------------------------------------------------------------------

if __name__ == "__main__":
    key = jax.random.PRNGKey(0)
    kp1, kp2, kp3, kx1, kx2, kx3 = jax.random.split(key, 6)
    N, H, W = 2, 16, 16

    configs = [
        # (inp, oup, stride, expand_ratio): residual, strided, and no-expand paths
        (8, 8, 1, 4),
        (8, 16, 2, 4),
        (16, 16, 1, 1),
    ]
    keys = [(kp1, kx1), (kp2, kx2), (kp3, kx3)]

    for (inp, oup, stride, er), (kp, kx) in zip(configs, keys):
        p = make_params(kp, inp, oup, er)
        x = jax.random.normal(kx, (N, inp, H, W), jnp.float32)
        y = inverted_residual(x, p, stride=stride, expand_ratio=er)
        jax.block_until_ready(y)
        r = ref_forward(x, p, stride, er)
        ho = (H - 1) // stride + 1
        assert y.shape == (N, oup, ho, ho), (y.shape, (N, oup, ho, ho))
        assert bool(jnp.allclose(y, r, rtol=1e-2, atol=1e-2)), \
            f"mismatch for config inp={inp} oup={oup} stride={stride} t={er}"

    print("KERNEL_OK")
</pallas_src>

<mosaic_0001>
module attributes {stable_mosaic.version = 11 : i64} {
  func.func @kernel(%arg0: i32, %arg1: i32, %arg2: memref<1x18x18x8xf32, #tpu.memory_space<vmem>>, %arg3: memref<8x32xf32, #tpu.memory_space<vmem>>, %arg4: memref<1x32xf32, #tpu.memory_space<vmem>>, %arg5: memref<9x32xf32, #tpu.memory_space<vmem>>, %arg6: memref<1x32xf32, #tpu.memory_space<vmem>>, %arg7: memref<32x8xf32, #tpu.memory_space<vmem>>, %arg8: memref<1x8xf32, #tpu.memory_space<vmem>>, %arg9: memref<1x8x16x8xf32, #tpu.memory_space<vmem>>, %arg10: memref<10x18x32xf32, #tpu.memory_space<vmem>>) attributes {dimension_semantics = [#tpu.dimension_semantics<parallel>, #tpu.dimension_semantics<parallel>], iteration_bounds = array<i64: 2, 2>, scalar_prefetch = 0 : i64, scratch_operands = 1 : i64, tpu.core_type = #tpu.core_type<tc>, window_params = [{transform_indices = @transform_0, window_bounds = array<i64: 1, 18, 18, 8>}, {pipeline_mode = #tpu.pipeline_mode<synchronous>, transform_indices = @transform_1, window_bounds = array<i64: 8, 32>}, {pipeline_mode = #tpu.pipeline_mode<synchronous>, transform_indices = @transform_2, window_bounds = array<i64: 1, 32>}, {pipeline_mode = #tpu.pipeline_mode<synchronous>, transform_indices = @transform_3, window_bounds = array<i64: 9, 32>}, {pipeline_mode = #tpu.pipeline_mode<synchronous>, transform_indices = @transform_4, window_bounds = array<i64: 1, 32>}, {pipeline_mode = #tpu.pipeline_mode<synchronous>, transform_indices = @transform_5, window_bounds = array<i64: 32, 8>}, {pipeline_mode = #tpu.pipeline_mode<synchronous>, transform_indices = @transform_6, window_bounds = array<i64: 1, 8>}, {transform_indices = @transform_7, window_bounds = array<i64: 1, 8, 16, 8>}]} {
    %c8_i32 = arith.constant 8 : i32
    %0 = arith.muli %arg1, %c8_i32 : i32
    %1 = tpu.iota {dimensions = array<i32: 0>} : vector<18x1xi32>
    %c1_i32 = arith.constant 1 : i32
    %2 = vector.broadcast %c1_i32 : i32 to vector<18x1xi32>
    %3 = arith.cmpi sge, %1, %2 : vector<18x1xi32>
    %c16_i32 = arith.constant 16 : i32
    %4 = vector.broadcast %c16_i32 : i32 to vector<18x1xi32>
    %5 = arith.cmpi sle, %1, %4 : vector<18x1xi32>
    %6 = arith.andi %3, %5 : vector<18x1xi1>
    %c0_i32 = arith.constant 0 : i32
    %7 = arith.addi %0, %c0_i32 : i32
    %c0 = arith.constant 0 : index
    %8 = arith.index_cast %7 : i32 to index
    %c0_0 = arith.constant 0 : index
    %c0_1 = arith.constant 0 : index
    %9 = vector.load %arg2[%c0, %8, %c0_0, %c0_1] : memref<1x18x18x8xf32, #tpu.memory_space<vmem>>, vector<1x1x18x8xf32>
    %10 = vector.shape_cast %9 : vector<1x1x18x8xf32> to vector<18x8xf32>
    %c0_2 = arith.constant 0 : index
    %c0_3 = arith.constant 0 : index
    %11 = vector.load %arg3[%c0_2, %c0_3] : memref<8x32xf32, #tpu.memory_space<vmem>>, vector<8x32xf32>
    %cst = arith.constant dense<0.000000e+00> : vector<18x32xf32>
    %12 = tpu.matmul %10, %11, %cst {dimension_numbers = #tpu.dot_dimension_numbers<[1], [0], [0], [1], [0, 0, 1, 1], [], []>} : vector<18x8xf32>, vector<8x32xf32>, vector<18x32xf32> -> vector<18x32xf32>
    %c0_4 = arith.constant 0 : index
    %c0_5 = arith.constant 0 : index
    %13 = vector.load %arg4[%c0_4, %c0_5] : memref<1x32xf32, #tpu.memory_space<vmem>>, vector<1x32xf32>
    %14 = vector.broadcast %13 : vector<1x32xf32> to vector<18x32xf32>
    %15 = arith.addf %12, %14 : vector<18x32xf32>
    %cst_6 = arith.constant 0.000000e+00 : f32
    %cst_7 = arith.constant 6.000000e+00 : f32
    %16 = vector.broadcast %cst_6 : f32 to vector<18x32xf32>
    %17 = arith.maximumf %16, %15 : vector<18x32xf32>
    %18 = vector.broadcast %cst_7 : f32 to vector<18x32xf32>
    %19 = arith.minimumf %18, %17 : vector<18x32xf32>
    %c1_i32_8 = arith.constant 1 : i32
    %20 = arith.cmpi sge, %7, %c1_i32_8 : i32
    %c16_i32_9 = arith.constant 16 : i32
    %21 = arith.cmpi sle, %7, %c16_i32_9 : i32
    %22 = arith.andi %20, %21 : i1
    %23 = vector.broadcast %22 : i1 to vector<18x1xi1>
    %24 = arith.andi %23, %6 : vector<18x1xi1>
    %cst_10 = arith.constant 0.000000e+00 : f32
    %25 = vector.shape_cast %24 : vector<18x1xi1> to vector<18x1xi1>
    %26 = vector.broadcast %25 : vector<18x1xi1> to vector<18x32xi1>
    %27 = vector.broadcast %cst_10 : f32 to vector<18x32xf32>
    %28 = arith.select %26, %19, %27 : vector<18x32xi1>, vector<18x32xf32>
    %c0_11 = arith.constant 0 : index
    %c0_12 = arith.constant 0 : index
    %c0_13 = arith.constant 0 : index
    %29 = vector.load %arg10[%c0_11, %c0_12, %c0_13] : memref<10x18x32xf32, #tpu.memory_space<vmem>>, vector<1x18x32xf32>
    %30 = vector.shape_cast %29 : vector<1x18x32xf32> to vector<18x32xf32>
    %31 = vector.shape_cast %28 : vector<18x32xf32> to vector<1x18x32xf32>
    tpu.vector_store %arg10[%c0_11, %c0_12, %c0_13], %31 {strides = array<i32>} : memref<10x18x32xf32, #tpu.memory_space<vmem>>, vector<1x18x32xf32>,
    %c1_i32_14 = arith.constant 1 : i32
    %32 = arith.addi %0, %c1_i32_14 : i32
    %c0_15 = arith.constant 0 : index
    %33 = arith.index_cast %32 : i32 to index
    %c0_16 = arith.constant 0 : index
    %c0_17 = arith.constant 0 : index
    %34 = vector.load %arg2[%c0_15, %33, %c0_16, %c0_17] : memref<1x18x18x8xf32, #tpu.memory_space<vmem>>, vector<1x1x18x8xf32>
    %35 = vector.shape_cast %34 : vector<1x1x18x8xf32> to vector<18x8xf32>
    %c0_18 = arith.constant 0 : index
    %c0_19 = arith.constant 0 : index
    %36 = vector.load %arg3[%c0_18, %c0_19] : memref<8x32xf32, #tpu.memory_space<vmem>>, vector<8x32xf32>
    %cst_20 = arith.constant dense<0.000000e+00> : vector<18x32xf32>
    %37 = tpu.matmul %35, %36, %cst_20 {dimension_numbers = #tpu.dot_dimension_numbers<[1], [0], [0], [1], [0, 0, 1, 1], [], []>} : vector<18x8xf32>, vector<8x32xf32>, vector<18x32xf32> -> vector<18x32xf32>
    %c0_21 = arith.constant 0 : index
    %c0_22 = arith.constant 0 : index
    %38 = vector.load %arg4[%c0_21, %c0_22] : memref<1x32xf32, #tpu.memory_space<vmem>>, vector<1x32xf32>
    %39 = vector.broadcast %38 : vector<1x32xf32> to vector<18x32xf32>
    %40 = arith.addf %37, %39 : vector<18x32xf32>
    %cst_23 = arith.constant 0.000000e+00 : f32
    %cst_24 = arith.constant 6.000000e+00 : f32
    %41 = vector.broadcast %cst_23 : f32 to vector<18x32xf32>
    %42 = arith.maximumf %41, %40 : vector<18x32xf32>
    %43 = vector.broadcast %cst_24 : f32 to vector<18x32xf32>
    %44 = arith.minimumf %43, %42 : vector<18x32xf32>
    %c1_i32_25 = arith.constant 1 : i32
    %45 = arith.cmpi sge, %32, %c1_i32_25 : i32
    %c16_i32_26 = arith.constant 16 : i32
    %46 = arith.cmpi sle, %32, %c16_i32_26 : i32
    %47 = arith.andi %45, %46 : i1
    %48 = vector.broadcast %47 : i1 to vector<18x1xi1>
    %49 = arith.andi %48, %6 : vector<18x1xi1>
    %cst_27 = arith.constant 0.000000e+00 : f32
    %50 = vector.shape_cast %49 : vector<18x1xi1> to vector<18x1xi1>
    %51 = vector.broadcast %50 : vector<18x1xi1> to vector<18x32xi1>
    %52 = vector.broadcast %cst_27 : f32 to vector<18x32xf32>
    %53 = arith.select %51, %44, %52 : vector<18x32xi1>, vector<18x32xf32>
    %c1 = arith.constant 1 : index
    %c0_28 = arith.constant 0 : index
    %c0_29 = arith.constant 0 : index
    %54 = vector.load %arg10[%c1, %c0_28, %c0_29] : memref<10x18x32xf32, #tpu.memory_space<vmem>>, vector<1x18x32xf32>
    %55 = vector.shape_cast %54 : vector<1x18x32xf32> to vector<18x32xf32>
    %56 = vector.shape_cast %53 : vector<18x32xf32> to vector<1x18x32xf32>
    tpu.vector_store %arg10[%c1, %c0_28, %c0_29], %56 {strides = array<i32>} : memref<10x18x32xf32, #tpu.memory_space<vmem>>, vector<1x18x32xf32>,
    %c2_i32 = arith.constant 2 : i32
    %57 = arith.addi %0, %c2_i32 : i32
    %c0_30 = arith.constant 0 : index
    %58 = arith.index_cast %57 : i32 to index
    %c0_31 = arith.constant 0 : index
    %c0_32 = arith.constant 0 : index
    %59 = vector.load %arg2[%c0_30, %58, %c0_31, %c0_32] : memref<1x18x18x8xf32, #tpu.memory_space<vmem>>, vector<1x1x18x8xf32>
    %60 = vector.shape_cast %59 : vector<1x1x18x8xf32> to vector<18x8xf32>
    %c0_33 = arith.constant 0 : index
    %c0_34 = arith.constant 0 : index
    %61 = vector.load %arg3[%c0_33, %c0_34] : memref<8x32xf32, #tpu.memory_space<vmem>>, vector<8x32xf32>
    %cst_35 = arith.constant dense<0.000000e+00> : vector<18x32xf32>
    %62 = tpu.matmul %60, %61, %cst_35 {dimension_numbers = #tpu.dot_dimension_numbers<[1], [0], [0], [1], [0, 0, 1, 1], [], []>} : vector<18x8xf32>, vector<8x32xf32>, vector<18x32xf32> -> vector<18x32xf32>
    %c0_36 = arith.constant 0 : index
    %c0_37 = arith.constant 0 : index
    %63 = vector.load %arg4[%c0_36, %c0_37] : memref<1x32xf32, #tpu.memory_space<vmem>>, vector<1x32xf32>
    %64 = vector.broadcast %63 : vector<1x32xf32> to vector<18x32xf32>
    %65 = arith.addf %62, %64 : vector<18x32xf32>
    %cst_38 = arith.constant 0.000000e+00 : f32
    %cst_39 = arith.constant 6.000000e+00 : f32
    %66 = vector.broadcast %cst_38 : f32 to vector<18x32xf32>
    %67 = arith.maximumf %66, %65 : vector<18x32xf32>
    %68 = vector.broadcast %cst_39 : f32 to vector<18x32xf32>
    %69 = arith.minimumf %68, %67 : vector<18x32xf32>
    %c1_i32_40 = arith.constant 1 : i32
    %70 = arith.cmpi sge, %57, %c1_i32_40 : i32
    %c16_i32_41 = arith.constant 16 : i32
    %71 = arith.cmpi sle, %57, %c16_i32_41 : i32
    %72 = arith.andi %70, %71 : i1
    %73 = vector.broadcast %72 : i1 to vector<18x1xi1>
    %74 = arith.andi %73, %6 : vector<18x1xi1>
    %cst_42 = arith.constant 0.000000e+00 : f32
    %75 = vector.shape_cast %74 : vector<18x1xi1> to vector<18x1xi1>
    %76 = vector.broadcast %75 : vector<18x1xi1> to vector<18x32xi1>
    %77 = vector.broadcast %cst_42 : f32 to vector<18x32xf32>
    %78 = arith.select %76, %69, %77 : vector<18x32xi1>, vector<18x32xf32>
    %c2 = arith.constant 2 : index
    %c0_43 = arith.constant 0 : index
    %c0_44 = arith.constant 0 : index
    %79 = vector.load %arg10[%c2, %c0_43, %c0_44] : memref<10x18x32xf32, #tpu.memory_space<vmem>>, vector<1x18x32xf32>
    %80 = vector.shape_cast %79 : vector<1x18x32xf32> to vector<18x32xf32>
    %81 = vector.shape_cast %78 : vector<18x32xf32> to vector<1x18x32xf32>
    tpu.vector_store %arg10[%c2, %c0_43, %c0_44], %81 {strides = array<i32>} : memref<10x18x32xf32, #tpu.memory_space<vmem>>, vector<1x18x32xf32>,
    %c3_i32 = arith.constant 3 : i32
    %82 = arith.addi %0, %c3_i32 : i32
    %c0_45 = arith.constant 0 : index
    %83 = arith.index_cast %82 : i32 to index
    %c0_46 = arith.constant 0 : index
    %c0_47 = arith.constant 0 : index
    %84 = vector.load %arg2[%c0_45, %83, %c0_46, %c0_47] : memref<1x18x18x8xf32, #tpu.memory_space<vmem>>, vector<1x1x18x8xf32>
    %85 = vector.shape_cast %84 : vector<1x1x18x8xf32> to vector<18x8xf32>
    %c0_48 = arith.constant 0 : index
    %c0_49 = arith.constant 0 : index
    %86 = vector.load %arg3[%c0_48, %c0_49] : memref<8x32xf32, #tpu.memory_space<vmem>>, vector<8x32xf32>
    %cst_50 = arith.constant dense<0.000000e+00> : vector<18x32xf32>
    %87 = tpu.matmul %85, %86, %cst_50 {dimension_numbers = #tpu.dot_dimension_numbers<[1], [0], [0], [1], [0, 0, 1, 1], [], []>} : vector<18x8xf32>, vector<8x32xf32>, vector<18x32xf32> -> vector<18x32xf32>
    %c0_51 = arith.constant 0 : index
    %c0_52 = arith.constant 0 : index
    %88 = vector.load %arg4[%c0_51, %c0_52] : memref<1x32xf32, #tpu.memory_space<vmem>>, vector<1x32xf32>
    %89 = vector.broadcast %88 : vector<1x32xf32> to vector<18x32xf32>
    %90 = arith.addf %87, %89 : vector<18x32xf32>
    %cst_53 = arith.constant 0.000000e+00 : f32
    %cst_54 = arith.constant 6.000000e+00 : f32
    %91 = vector.broadcast %cst_53 : f32 to vector<18x32xf32>
    %92 = arith.maximumf %91, %90 : vector<18x32xf32>
    %93 = vector.broadcast %cst_54 : f32 to vector<18x32xf32>
    %94 = arith.minimumf %93, %92 : vector<18x32xf32>
    %c1_i32_55 = arith.constant 1 : i32
    %95 = arith.cmpi sge, %82, %c1_i32_55 : i32
    %c16_i32_56 = arith.constant 16 : i32
    %96 = arith.cmpi sle, %82, %c16_i32_56 : i32
    %97 = arith.andi %95, %96 : i1
    %98 = vector.broadcast %97 : i1 to vector<18x1xi1>
    %99 = arith.andi %98, %6 : vector<18x1xi1>
    %cst_57 = arith.constant 0.000000e+00 : f32
    %100 = vector.shape_cast %99 : vector<18x1xi1> to vector<18x1xi1>
    %101 = vector.broadcast %100 : vector<18x1xi1> to vector<18x32xi1>
    %102 = vector.broadcast %cst_57 : f32 to vector<18x32xf32>
    %103 = arith.select %101, %94, %102 : vector<18x32xi1>, vector<18x32xf32>
    %c3 = arith.constant 3 : index
    %c0_58 = arith.constant 0 : index
    %c0_59 = arith.constant 0 : index
    %104 = vector.load %arg10[%c3, %c0_58, %c0_59] : memref<10x18x32xf32, #tpu.memory_space<vmem>>, vector<1x18x32xf32>
    %105 = vector.shape_cast %104 : vector<1x18x32xf32> to vector<18x32xf32>
    %106 = vector.shape_cast %103 : vector<18x32xf32> to vector<1x18x32xf32>
    tpu.vector_store %arg10[%c3, %c0_58, %c0_59], %106 {strides = array<i32>} : memref<10x18x32xf32, #tpu.memory_space<vmem>>, vector<1x18x32xf32>,
    %c4_i32 = arith.constant 4 : i32
    %107 = arith.addi %0, %c4_i32 : i32
    %c0_60 = arith.constant 0 : index
    %108 = arith.index_cast %107 : i32 to index
    %c0_61 = arith.constant 0 : index
    %c0_62 = arith.constant 0 : index
    %109 = vector.load %arg2[%c0_60, %108, %c0_61, %c0_62] : memref<1x18x18x8xf32, #tpu.memory_space<vmem>>, vector<1x1x18x8xf32>
    %110 = vector.shape_cast %109 : vector<1x1x18x8xf32> to vector<18x8xf32>
    %c0_63 = arith.constant 0 : index
    %c0_64 = arith.constant 0 : index
    %111 = vector.load %arg3[%c0_63, %c0_64] : memref<8x32xf32, #tpu.memory_space<vmem>>, vector<8x32xf32>
    %cst_65 = arith.constant dense<0.000000e+00> : vector<18x32xf32>
    %112 = tpu.matmul %110, %111, %cst_65 {dimension_numbers = #tpu.dot_dimension_numbers<[1], [0], [0], [1], [0, 0, 1, 1], [], []>} : vector<18x8xf32>, vector<8x32xf32>, vector<18x32xf32> -> vector<18x32xf32>
    %c0_66 = arith.constant 0 : index
    %c0_67 = arith.constant 0 : index
    %113 = vector.load %arg4[%c0_66, %c0_67] : memref<1x32xf32, #tpu.memory_space<vmem>>, vector<1x32xf32>
    %114 = vector.broadcast %113 : vector<1x32xf32> to vector<18x32xf32>
    %115 = arith.addf %112, %114 : vector<18x32xf32>
    %cst_68 = arith.constant 0.000000e+00 : f32
    %cst_69 = arith.constant 6.000000e+00 : f32
    %116 = vector.broadcast %cst_68 : f32 to vector<18x32xf32>
    %117 = arith.maximumf %116, %115 : vector<18x32xf32>
    %118 = vector.broadcast %cst_69 : f32 to vector<18x32xf32>
    %119 = arith.minimumf %118, %117 : vector<18x32xf32>
    %c1_i32_70 = arith.constant 1 : i32
    %120 = arith.cmpi sge, %107, %c1_i32_70 : i32
    %c16_i32_71 = arith.constant 16 : i32
    %121 = arith.cmpi sle, %107, %c16_i32_71 : i32
    %122 = arith.andi %120, %121 : i1
    %123 = vector.broadcast %122 : i1 to vector<18x1xi1>
    %124 = arith.andi %123, %6 : vector<18x1xi1>
    %cst_72 = arith.constant 0.000000e+00 : f32
    %125 = vector.shape_cast %124 : vector<18x1xi1> to vector<18x1xi1>
    %126 = vector.broadcast %125 : vector<18x1xi1> to vector<18x32xi1>
    %127 = vector.broadcast %cst_72 : f32 to vector<18x32xf32>
    %128 = arith.select %126, %119, %127 : vector<18x32xi1>, vector<18x32xf32>
    %c4 = arith.constant 4 : index
    %c0_73 = arith.constant 0 : index
    %c0_74 = arith.constant 0 : index
    %129 = vector.load %arg10[%c4, %c0_73, %c0_74] : memref<10x18x32xf32, #tpu.memory_space<vmem>>, vector<1x18x32xf32>
    %130 = vector.shape_cast %129 : vector<1x18x32xf32> to vector<18x32xf32>
    %131 = vector.shape_cast %128 : vector<18x32xf32> to vector<1x18x32xf32>
    tpu.vector_store %arg10[%c4, %c0_73, %c0_74], %131 {strides = array<i32>} : memref<10x18x32xf32, #tpu.memory_space<vmem>>, vector<1x18x32xf32>,
    %c5_i32 = arith.constant 5 : i32
    %132 = arith.addi %0, %c5_i32 : i32
    %c0_75 = arith.constant 0 : index
    %133 = arith.index_cast %132 : i32 to index
    %c0_76 = arith.constant 0 : index
    %c0_77 = arith.constant 0 : index
    %134 = vector.load %arg2[%c0_75, %133, %c0_76, %c0_77] : memref<1x18x18x8xf32, #tpu.memory_space<vmem>>, vector<1x1x18x8xf32>
    %135 = vector.shape_cast %134 : vector<1x1x18x8xf32> to vector<18x8xf32>
    %c0_78 = arith.constant 0 : index
    %c0_79 = arith.constant 0 : index
    %136 = vector.load %arg3[%c0_78, %c0_79] : memref<8x32xf32, #tpu.memory_space<vmem>>, vector<8x32xf32>
    %cst_80 = arith.constant dense<0.000000e+00> : vector<18x32xf32>
    %137 = tpu.matmul %135, %136, %cst_80 {dimension_numbers = #tpu.dot_dimension_numbers<[1], [0], [0], [1], [0, 0, 1, 1], [], []>} : vector<18x8xf32>, vector<8x32xf32>, vector<18x32xf32> -> vector<18x32xf32>
    %c0_81 = arith.constant 0 : index
    %c0_82 = arith.constant 0 : index
    %138 = vector.load %arg4[%c0_81, %c0_82] : memref<1x32xf32, #tpu.memory_space<vmem>>, vector<1x32xf32>
    %139 = vector.broadcast %138 : vector<1x32xf32> to vector<18x32xf32>
    %140 = arith.addf %137, %139 : vector<18x32xf32>
    %cst_83 = arith.constant 0.000000e+00 : f32
    %cst_84 = arith.constant 6.000000e+00 : f32
    %141 = vector.broadcast %cst_83 : f32 to vector<18x32xf32>
    %142 = arith.maximumf %141, %140 : vector<18x32xf32>
    %143 = vector.broadcast %cst_84 : f32 to vector<18x32xf32>
    %144 = arith.minimumf %143, %142 : vector<18x32xf32>
    %c1_i32_85 = arith.constant 1 : i32
    %145 = arith.cmpi sge, %132, %c1_i32_85 : i32
    %c16_i32_86 = arith.constant 16 : i32
    %146 = arith.cmpi sle, %132, %c16_i32_86 : i32
    %147 = arith.andi %145, %146 : i1
    %148 = vector.broadcast %147 : i1 to vector<18x1xi1>
    %149 = arith.andi %148, %6 : vector<18x1xi1>
    %cst_87 = arith.constant 0.000000e+00 : f32
    %150 = vector.shape_cast %149 : vector<18x1xi1> to vector<18x1xi1>
    %151 = vector.broadcast %150 : vector<18x1xi1> to vector<18x32xi1>
    %152 = vector.broadcast %cst_87 : f32 to vector<18x32xf32>
    %153 = arith.select %151, %144, %152 : vector<18x32xi1>, vector<18x32xf32>
    %c5 = arith.constant 5 : index
    %c0_88 = arith.constant 0 : index
    %c0_89 = arith.constant 0 : index
    %154 = vector.load %arg10[%c5, %c0_88, %c0_89] : memref<10x18x32xf32, #tpu.memory_space<vmem>>, vector<1x18x32xf32>
    %155 = vector.shape_cast %154 : vector<1x18x32xf32> to vector<18x32xf32>
    %156 = vector.shape_cast %153 : vector<18x32xf32> to vector<1x18x32xf32>
    tpu.vector_store %arg10[%c5, %c0_88, %c0_89], %156 {strides = array<i32>} : memref<10x18x32xf32, #tpu.memory_space<vmem>>, vector<1x18x32xf32>,
    %c6_i32 = arith.constant 6 : i32
    %157 = arith.addi %0, %c6_i32 : i32
    %c0_90 = arith.constant 0 : index
    %158 = arith.index_cast %157 : i32 to index
    %c0_91 = arith.constant 0 : index
    %c0_92 = arith.constant 0 : index
    %159 = vector.load %arg2[%c0_90, %158, %c0_91, %c0_92] : memref<1x18x18x8xf32, #tpu.memory_space<vmem>>, vector<1x1x18x8xf32>
    %160 = vector.shape_cast %159 : vector<1x1x18x8xf32> to vector<18x8xf32>
    %c0_93 = arith.constant 0 : index
    %c0_94 = arith.constant 0 : index
    %161 = vector.load %arg3[%c0_93, %c0_94] : memref<8x32xf32, #tpu.memory_space<vmem>>, vector<8x32xf32>
    %cst_95 = arith.constant dense<0.000000e+00> : vector<18x32xf32>
    %162 = tpu.matmul %160, %161, %cst_95 {dimension_numbers = #tpu.dot_dimension_numbers<[1], [0], [0], [1], [0, 0, 1, 1], [], []>} : vector<18x8xf32>, vector<8x32xf32>, vector<18x32xf32> -> vector<18x32xf32>
    %c0_96 = arith.constant 0 : index
    %c0_97 = arith.constant 0 : index
    %163 = vector.load %arg4[%c0_96, %c0_97] : memref<1x32xf32, #tpu.memory_space<vmem>>, vector<1x32xf32>
    %164 = vector.broadcast %163 : vector<1x32xf32> to vector<18x32xf32>
    %165 = arith.addf %162, %164 : vector<18x32xf32>
    %cst_98 = arith.constant 0.000000e+00 : f32
    %cst_99 = arith.constant 6.000000e+00 : f32
    %166 = vector.broadcast %cst_98 : f32 to vector<18x32xf32>
    %167 = arith.maximumf %166, %165 : vector<18x32xf32>
    %168 = vector.broadcast %cst_99 : f32 to vector<18x32xf32>
    %169 = arith.minimumf %168, %167 : vector<18x32xf32>
    %c1_i32_100 = arith.constant 1 : i32
    %170 = arith.cmpi sge, %157, %c1_i32_100 : i32
    %c16_i32_101 = arith.constant 16 : i32
    %171 = arith.cmpi sle, %157, %c16_i32_101 : i32
    %172 = arith.andi %170, %171 : i1
    %173 = vector.broadcast %172 : i1 to vector<18x1xi1>
    %174 = arith.andi %173, %6 : vector<18x1xi1>
    %cst_102 = arith.constant 0.000000e+00 : f32
    %175 = vector.shape_cast %174 : vector<18x1xi1> to vector<18x1xi1>
    %176 = vector.broadcast %175 : vector<18x1xi1> to vector<18x32xi1>
    %177 = vector.broadcast %cst_102 : f32 to vector<18x32xf32>
    %178 = arith.select %176, %169, %177 : vector<18x32xi1>, vector<18x32xf32>
    %c6 = arith.constant 6 : index
    %c0_103 = arith.constant 0 : index
    %c0_104 = arith.constant 0 : index
    %179 = vector.load %arg10[%c6, %c0_103, %c0_104] : memref<10x18x32xf32, #tpu.memory_space<vmem>>, vector<1x18x32xf32>
    %180 = vector.shape_cast %179 : vector<1x18x32xf32> to vector<18x32xf32>
    %181 = vector.shape_cast %178 : vector<18x32xf32> to vector<1x18x32xf32>
    tpu.vector_store %arg10[%c6, %c0_103, %c0_104], %181 {strides = array<i32>} : memref<10x18x32xf32, #tpu.memory_space<vmem>>, vector<1x18x32xf32>,
    %c7_i32 = arith.constant 7 : i32
    %182 = arith.addi %0, %c7_i32 : i32
    %c0_105 = arith.constant 0 : index
    %183 = arith.index_cast %182 : i32 to index
    %c0_106 = arith.constant 0 : index
    %c0_107 = arith.constant 0 : index
    %184 = vector.load %arg2[%c0_105, %183, %c0_106, %c0_107] : memref<1x18x18x8xf32, #tpu.memory_space<vmem>>, vector<1x1x18x8xf32>
    %185 = vector.shape_cast %184 : vector<1x1x18x8xf32> to vector<18x8xf32>
    %c0_108 = arith.constant 0 : index
    %c0_109 = arith.constant 0 : index
    %186 = vector.load %arg3[%c0_108, %c0_109] : memref<8x32xf32, #tpu.memory_space<vmem>>, vector<8x32xf32>
    %cst_110 = arith.constant dense<0.000000e+00> : vector<18x32xf32>
    %187 = tpu.matmul %185, %186, %cst_110 {dimension_numbers = #tpu.dot_dimension_numbers<[1], [0], [0], [1], [0, 0, 1, 1], [], []>} : vector<18x8xf32>, vector<8x32xf32>, vector<18x32xf32> -> vector<18x32xf32>
    %c0_111 = arith.constant 0 : index
    %c0_112 = arith.constant 0 : index
    %188 = vector.load %arg4[%c0_111, %c0_112] : memref<1x32xf32, #tpu.memory_space<vmem>>, vector<1x32xf32>
    %189 = vector.broadcast %188 : vector<1x32xf32> to vector<18x32xf32>
    %190 = arith.addf %187, %189 : vector<18x32xf32>
    %cst_113 = arith.constant 0.000000e+00 : f32
    %cst_114 = arith.constant 6.000000e+00 : f32
    %191 = vector.broadcast %cst_113 : f32 to vector<18x32xf32>
    %192 = arith.maximumf %191, %190 : vector<18x32xf32>
    %193 = vector.broadcast %cst_114 : f32 to vector<18x32xf32>
    %194 = arith.minimumf %193, %192 : vector<18x32xf32>
    %c1_i32_115 = arith.constant 1 : i32
    %195 = arith.cmpi sge, %182, %c1_i32_115 : i32
    %c16_i32_116 = arith.constant 16 : i32
    %196 = arith.cmpi sle, %182, %c16_i32_116 : i32
    %197 = arith.andi %195, %196 : i1
    %198 = vector.broadcast %197 : i1 to vector<18x1xi1>
    %199 = arith.andi %198, %6 : vector<18x1xi1>
    %cst_117 = arith.constant 0.000000e+00 : f32
    %200 = vector.shape_cast %199 : vector<18x1xi1> to vector<18x1xi1>
    %201 = vector.broadcast %200 : vector<18x1xi1> to vector<18x32xi1>
    %202 = vector.broadcast %cst_117 : f32 to vector<18x32xf32>
    %203 = arith.select %201, %194, %202 : vector<18x32xi1>, vector<18x32xf32>
    %c7 = arith.constant 7 : index
    %c0_118 = arith.constant 0 : index
    %c0_119 = arith.constant 0 : index
    %204 = vector.load %arg10[%c7, %c0_118, %c0_119] : memref<10x18x32xf32, #tpu.memory_space<vmem>>, vector<1x18x32xf32>
    %205 = vector.shape_cast %204 : vector<1x18x32xf32> to vector<18x32xf32>
    %206 = vector.shape_cast %203 : vector<18x32xf32> to vector<1x18x32xf32>
    tpu.vector_store %arg10[%c7, %c0_118, %c0_119], %206 {strides = array<i32>} : memref<10x18x32xf32, #tpu.memory_space<vmem>>, vector<1x18x32xf32>,
    %c8_i32_120 = arith.constant 8 : i32
    %207 = arith.addi %0, %c8_i32_120 : i32
    %c0_121 = arith.constant 0 : index
    %208 = arith.index_cast %207 : i32 to index
    %c0_122 = arith.constant 0 : index
    %c0_123 = arith.constant 0 : index
    %209 = vector.load %arg2[%c0_121, %208, %c0_122, %c0_123] : memref<1x18x18x8xf32, #tpu.memory_space<vmem>>, vector<1x1x18x8xf32>
    %210 = vector.shape_cast %209 : vector<1x1x18x8xf32> to vector<18x8xf32>
    %c0_124 = arith.constant 0 : index
    %c0_125 = arith.constant 0 : index
    %211 = vector.load %arg3[%c0_124, %c0_125] : memref<8x32xf32, #tpu.memory_space<vmem>>, vector<8x32xf32>
    %cst_126 = arith.constant dense<0.000000e+00> : vector<18x32xf32>
    %212 = tpu.matmul %210, %211, %cst_126 {dimension_numbers = #tpu.dot_dimension_numbers<[1], [0], [0], [1], [0, 0, 1, 1], [], []>} : vector<18x8xf32>, vector<8x32xf32>, vector<18x32xf32> -> vector<18x32xf32>
    %c0_127 = arith.constant 0 : index
    %c0_128 = arith.constant 0 : index
    %213 = vector.load %arg4[%c0_127, %c0_128] : memref<1x32xf32, #tpu.memory_space<vmem>>, vector<1x32xf32>
    %214 = vector.broadcast %213 : vector<1x32xf32> to vector<18x32xf32>
    %215 = arith.addf %212, %214 : vector<18x32xf32>
    %cst_129 = arith.constant 0.000000e+00 : f32
    %cst_130 = arith.constant 6.000000e+00 : f32
    %216 = vector.broadcast %cst_129 : f32 to vector<18x32xf32>
    %217 = arith.maximumf %216, %215 : vector<18x32xf32>
    %218 = vector.broadcast %cst_130 : f32 to vector<18x32xf32>
    %219 = arith.minimumf %218, %217 : vector<18x32xf32>
    %c1_i32_131 = arith.constant 1 : i32
    %220 = arith.cmpi sge, %207, %c1_i32_131 : i32
    %c16_i32_132 = arith.constant 16 : i32
    %221 = arith.cmpi sle, %207, %c16_i32_132 : i32
    %222 = arith.andi %220, %221 : i1
    %223 = vector.broadcast %222 : i1 to vector<18x1xi1>
    %224 = arith.andi %223, %6 : vector<18x1xi1>
    %cst_133 = arith.constant 0.000000e+00 : f32
    %225 = vector.shape_cast %224 : vector<18x1xi1> to vector<18x1xi1>
    %226 = vector.broadcast %225 : vector<18x1xi1> to vector<18x32xi1>
    %227 = vector.broadcast %cst_133 : f32 to vector<18x32xf32>
    %228 = arith.select %226, %219, %227 : vector<18x32xi1>, vector<18x32xf32>
    %c8 = arith.constant 8 : index
    %c0_134 = arith.constant 0 : index
    %c0_135 = arith.constant 0 : index
    %229 = vector.load %arg10[%c8, %c0_134, %c0_135] : memref<10x18x32xf32, #tpu.memory_space<vmem>>, vector<1x18x32xf32>
    %230 = vector.shape_cast %229 : vector<1x18x32xf32> to vector<18x32xf32>
    %231 = vector.shape_cast %228 : vector<18x32xf32> to vector<1x18x32xf32>
    tpu.vector_store %arg10[%c8, %c0_134, %c0_135], %231 {strides = array<i32>} : memref<10x18x32xf32, #tpu.memory_space<vmem>>, vector<1x18x32xf32>,
    %c9_i32 = arith.constant 9 : i32
    %232 = arith.addi %0, %c9_i32 : i32
    %c0_136 = arith.constant 0 : index
    %233 = arith.index_cast %232 : i32 to index
    %c0_137 = arith.constant 0 : index
    %c0_138 = arith.constant 0 : index
    %234 = vector.load %arg2[%c0_136, %233, %c0_137, %c0_138] : memref<1x18x18x8xf32, #tpu.memory_space<vmem>>, vector<1x1x18x8xf32>
    %235 = vector.shape_cast %234 : vector<1x1x18x8xf32> to vector<18x8xf32>
    %c0_139 = arith.constant 0 : index
    %c0_140 = arith.constant 0 : index
    %236 = vector.load %arg3[%c0_139, %c0_140] : memref<8x32xf32, #tpu.memory_space<vmem>>, vector<8x32xf32>
    %cst_141 = arith.constant dense<0.000000e+00> : vector<18x32xf32>
    %237 = tpu.matmul %235, %236, %cst_141 {dimension_numbers = #tpu.dot_dimension_numbers<[1], [0], [0], [1], [0, 0, 1, 1], [], []>} : vector<18x8xf32>, vector<8x32xf32>, vector<18x32xf32> -> vector<18x32xf32>
    %c0_142 = arith.constant 0 : index
    %c0_143 = arith.constant 0 : index
    %238 = vector.load %arg4[%c0_142, %c0_143] : memref<1x32xf32, #tpu.memory_space<vmem>>, vector<1x32xf32>
    %239 = vector.broadcast %238 : vector<1x32xf32> to vector<18x32xf32>
    %240 = arith.addf %237, %239 : vector<18x32xf32>
    %cst_144 = arith.constant 0.000000e+00 : f32
    %cst_145 = arith.constant 6.000000e+00 : f32
    %241 = vector.broadcast %cst_144 : f32 to vector<18x32xf32>
    %242 = arith.maximumf %241, %240 : vector<18x32xf32>
    %243 = vector.broadcast %cst_145 : f32 to vector<18x32xf32>
    %244 = arith.minimumf %243, %242 : vector<18x32xf32>
    %c1_i32_146 = arith.constant 1 : i32
    %245 = arith.cmpi sge, %232, %c1_i32_146 : i32
    %c16_i32_147 = arith.constant 16 : i32
    %246 = arith.cmpi sle, %232, %c16_i32_147 : i32
    %247 = arith.andi %245, %246 : i1
    %248 = vector.broadcast %247 : i1 to vector<18x1xi1>
    %249 = arith.andi %248, %6 : vector<18x1xi1>
    %cst_148 = arith.constant 0.000000e+00 : f32
    %250 = vector.shape_cast %249 : vector<18x1xi1> to vector<18x1xi1>
    %251 = vector.broadcast %250 : vector<18x1xi1> to vector<18x32xi1>
    %252 = vector.broadcast %cst_148 : f32 to vector<18x32xf32>
    %253 = arith.select %251, %244, %252 : vector<18x32xi1>, vector<18x32xf32>
    %c9 = arith.constant 9 : index
    %c0_149 = arith.constant 0 : index
    %c0_150 = arith.constant 0 : index
    %254 = vector.load %arg10[%c9, %c0_149, %c0_150] : memref<10x18x32xf32, #tpu.memory_space<vmem>>, vector<1x18x32xf32>
    %255 = vector.shape_cast %254 : vector<1x18x32xf32> to vector<18x32xf32>
    %256 = vector.shape_cast %253 : vector<18x32xf32> to vector<1x18x32xf32>
    tpu.vector_store %arg10[%c9, %c0_149, %c0_150], %256 {strides = array<i32>} : memref<10x18x32xf32, #tpu.memory_space<vmem>>, vector<1x18x32xf32>,
    %cst_151 = arith.constant 0.000000e+00 : f32
    %257 = vector.broadcast %cst_151 : f32 to vector<8x16x32xf32>
    %c0_152 = arith.constant 0 : index
    %c0_153 = arith.constant 0 : index
    %c0_154 = arith.constant 0 : index
    %258 = vector.load %arg10[%c0_152, %c0_153, %c0_154] : memref<10x18x32xf32, #tpu.memory_space<vmem>>, vector<8x16x32xf32>
    %c0_155 = arith.constant 0 : index
    %c0_156 = arith.constant 0 : index
    %259 = vector.load %arg5[%c0_155, %c0_156] : memref<9x32xf32, #tpu.memory_space<vmem>>, vector<1x32xf32>
    %260 = vector.shape_cast %259 : vector<1x32xf32> to vector<1x1x32xf32>
    %261 = vector.broadcast %260 : vector<1x1x32xf32> to vector<8x16x32xf32>
    %262 = arith.mulf %258, %261 : vector<8x16x32xf32>
    %263 = arith.addf %257, %262 : vector<8x16x32xf32>
    %c0_157 = arith.constant 0 : index
    %c1_158 = arith.constant 1 : index
    %c0_159 = arith.constant 0 : index
    %264 = vector.load %arg10[%c0_157, %c1_158, %c0_159] : memref<10x18x32xf32, #tpu.memory_space<vmem>>, vector<8x16x32xf32>
    %c1_160 = arith.constant 1 : index
    %c0_161 = arith.constant 0 : index
    %265 = vector.load %arg5[%c1_160, %c0_161] : memref<9x32xf32, #tpu.memory_space<vmem>>, vector<1x32xf32>
    %266 = vector.shape_cast %265 : vector<1x32xf32> to vector<1x1x32xf32>
    %267 = vector.broadcast %266 : vector<1x1x32xf32> to vector<8x16x32xf32>
    %268 = arith.mulf %264, %267 : vector<8x16x32xf32>
    %269 = arith.addf %263, %268 : vector<8x16x32xf32>
    %c0_162 = arith.constant 0 : index
    %c2_163 = arith.constant 2 : index
    %c0_164 = arith.constant 0 : index
    %270 = vector.load %arg10[%c0_162, %c2_163, %c0_164] : memref<10x18x32xf32, #tpu.memory_space<vmem>>, vector<8x16x32xf32>
    %c2_165 = arith.constant 2 : index
    %c0_166 = arith.constant 0 : index
    %271 = vector.load %arg5[%c2_165, %c0_166] : memref<9x32xf32, #tpu.memory_space<vmem>>, vector<1x32xf32>
    %272 = vector.shape_cast %271 : vector<1x32xf32> to vector<1x1x32xf32>
    %273 = vector.broadcast %272 : vector<1x1x32xf32> to vector<8x16x32xf32>
    %274 = arith.mulf %270, %273 : vector<8x16x32xf32>
    %275 = arith.addf %269, %274 : vector<8x16x32xf32>
    %c1_167 = arith.constant 1 : index
    %c0_168 = arith.constant 0 : index
    %c0_169 = arith.constant 0 : index
    %276 = vector.load %arg10[%c1_167, %c0_168, %c0_169] : memref<10x18x32xf32, #tpu.memory_space<vmem>>, vector<8x16x32xf32>
    %c3_170 = arith.constant 3 : index
    %c0_171 = arith.constant 0 : index
    %277 = vector.load %arg5[%c3_170, %c0_171] : memref<9x32xf32, #tpu.memory_space<vmem>>, vector<1x32xf32>
    %278 = vector.shape_cast %277 : vector<1x32xf32> to vector<1x1x32xf32>
    %279 = vector.broadcast %278 : vector<1x1x32xf32> to vector<8x16x32xf32>
    %280 = arith.mulf %276, %279 : vector<8x16x32xf32>
    %281 = arith.addf %275, %280 : vector<8x16x32xf32>
    %c1_172 = arith.constant 1 : index
    %c1_173 = arith.constant 1 : index
    %c0_174 = arith.constant 0 : index
    %282 = vector.load %arg10[%c1_172, %c1_173, %c0_174] : memref<10x18x32xf32, #tpu.memory_space<vmem>>, vector<8x16x32xf32>
    %c4_175 = arith.constant 4 : index
    %c0_176 = arith.constant 0 : index
    %283 = vector.load %arg5[%c4_175, %c0_176] : memref<9x32xf32, #tpu.memory_space<vmem>>, vector<1x32xf32>
    %284 = vector.shape_cast %283 : vector<1x32xf32> to vector<1x1x32xf32>
    %285 = vector.broadcast %284 : vector<1x1x32xf32> to vector<8x16x32xf32>
    %286 = arith.mulf %282, %285 : vector<8x16x32xf32>
    %287 = arith.addf %281, %286 : vector<8x16x32xf32>
    %c1_177 = arith.constant 1 : index
    %c2_178 = arith.constant 2 : index
    %c0_179 = arith.constant 0 : index
    %288 = vector.load %arg10[%c1_177, %c2_178, %c0_179] : memref<10x18x32xf32, #tpu.memory_space<vmem>>, vector<8x16x32xf32>
    %c5_180 = arith.constant 5 : index
    %c0_181 = arith.constant 0 : index
    %289 = vector.load %arg5[%c5_180, %c0_181] : memref<9x32xf32, #tpu.memory_space<vmem>>, vector<1x32xf32>
    %290 = vector.shape_cast %289 : vector<1x32xf32> to vector<1x1x32xf32>
    %291 = vector.broadcast %290 : vector<1x1x32xf32> to vector<8x16x32xf32>
    %292 = arith.mulf %288, %291 : vector<8x16x32xf32>
    %293 = arith.addf %287, %292 : vector<8x16x32xf32>
    %c2_182 = arith.constant 2 : index
    %c0_183 = arith.constant 0 : index
    %c0_184 = arith.constant 0 : index
    %294 = vector.load %arg10[%c2_182, %c0_183, %c0_184] : memref<10x18x32xf32, #tpu.memory_space<vmem>>, vector<8x16x32xf32>
    %c6_185 = arith.constant 6 : index
    %c0_186 = arith.constant 0 : index
    %295 = vector.load %arg5[%c6_185, %c0_186] : memref<9x32xf32, #tpu.memory_space<vmem>>, vector<1x32xf32>
    %296 = vector.shape_cast %295 : vector<1x32xf32> to vector<1x1x32xf32>
    %297 = vector.broadcast %296 : vector<1x1x32xf32> to vector<8x16x32xf32>
    %298 = arith.mulf %294, %297 : vector<8x16x32xf32>
    %299 = arith.addf %293, %298 : vector<8x16x32xf32>
    %c2_187 = arith.constant 2 : index
    %c1_188 = arith.constant 1 : index
    %c0_189 = arith.constant 0 : index
    %300 = vector.load %arg10[%c2_187, %c1_188, %c0_189] : memref<10x18x32xf32, #tpu.memory_space<vmem>>, vector<8x16x32xf32>
    %c7_190 = arith.constant 7 : index
    %c0_191 = arith.constant 0 : index
    %301 = vector.load %arg5[%c7_190, %c0_191] : memref<9x32xf32, #tpu.memory_space<vmem>>, vector<1x32xf32>
    %302 = vector.shape_cast %301 : vector<1x32xf32> to vector<1x1x32xf32>
    %303 = vector.broadcast %302 : vector<1x1x32xf32> to vector<8x16x32xf32>
    %304 = arith.mulf %300, %303 : vector<8x16x32xf32>
    %305 = arith.addf %299, %304 : vector<8x16x32xf32>
    %c2_192 = arith.constant 2 : index
    %c2_193 = arith.constant 2 : index
    %c0_194 = arith.constant 0 : index
    %306 = vector.load %arg10[%c2_192, %c2_193, %c0_194] : memref<10x18x32xf32, #tpu.memory_space<vmem>>, vector<8x16x32xf32>
    %c8_195 = arith.constant 8 : index
    %c0_196 = arith.constant 0 : index
    %307 = vector.load %arg5[%c8_195, %c0_196] : memref<9x32xf32, #tpu.memory_space<vmem>>, vector<1x32xf32>
    %308 = vector.shape_cast %307 : vector<1x32xf32> to vector<1x1x32xf32>
    %309 = vector.broadcast %308 : vector<1x1x32xf32> to vector<8x16x32xf32>
    %310 = arith.mulf %306, %309 : vector<8x16x32xf32>
    %311 = arith.addf %305, %310 : vector<8x16x32xf32>
    %c0_197 = arith.constant 0 : index
    %c0_198 = arith.constant 0 : index
    %312 = vector.load %arg6[%c0_197, %c0_198] : memref<1x32xf32, #tpu.memory_space<vmem>>, vector<1x32xf32>
    %313 = vector.shape_cast %312 : vector<1x32xf32> to vector<1x1x32xf32>
    %314 = vector.broadcast %313 : vector<1x1x32xf32> to vector<8x16x32xf32>
    %315 = arith.addf %311, %314 : vector<8x16x32xf32>
    %cst_199 = arith.constant 0.000000e+00 : f32
    %cst_200 = arith.constant 6.000000e+00 : f32
    %316 = vector.broadcast %cst_199 : f32 to vector<8x16x32xf32>
    %317 = arith.maximumf %316, %315 : vector<8x16x32xf32>
    %318 = vector.broadcast %cst_200 : f32 to vector<8x16x32xf32>
    %319 = arith.minimumf %318, %317 : vector<8x16x32xf32>
    %c0_201 = arith.constant 0 : index
    %c0_202 = arith.constant 0 : index
    %320 = vector.load %arg7[%c0_201, %c0_202] : memref<32x8xf32, #tpu.memory_space<vmem>>, vector<32x8xf32>
    %c0_203 = arith.constant 0 : index
    %c0_204 = arith.constant 0 : index
    %321 = vector.load %arg8[%c0_203, %c0_204] : memref<1x8xf32, #tpu.memory_space<vmem>>, vector<1x8xf32>
    %322 = vector.extract_strided_slice %319 {offsets = [0, 0, 0], sizes = [1, 16, 32], strides = [1, 1, 1]} : vector<8x16x32xf32> to vector<1x16x32xf32>
    %323 = vector.shape_cast %322 : vector<1x16x32xf32> to vector<16x32xf32>
    %cst_205 = arith.constant dense<0.000000e+00> : vector<16x8xf32>
    %324 = tpu.matmul %323, %320, %cst_205 {dimension_numbers = #tpu.dot_dimension_numbers<[1], [0], [0], [1], [0, 0, 1, 1], [], []>} : vector<16x32xf32>, vector<32x8xf32>, vector<16x8xf32> -> vector<16x8xf32>
    %325 = vector.broadcast %321 : vector<1x8xf32> to vector<16x8xf32>
    %326 = arith.addf %324, %325 : vector<16x8xf32>
    %c1_i32_206 = arith.constant 1 : i32
    %327 = arith.addi %0, %c1_i32_206 : i32
    %c0_i32_207 = arith.constant 0 : i32
    %328 = arith.addi %327, %c0_i32_207 : i32
    %c0_208 = arith.constant 0 : index
    %329 = arith.index_cast %328 : i32 to index
    %c1_209 = arith.constant 1 : index
    %c0_210 = arith.constant 0 : index
    %330 = vector.load %arg2[%c0_208, %329, %c1_209, %c0_210] : memref<1x18x18x8xf32, #tpu.memory_space<vmem>>, vector<1x1x16x8xf32>
    %331 = vector.shape_cast %330 : vector<1x1x16x8xf32> to vector<16x8xf32>
    %332 = arith.addf %326, %331 : vector<16x8xf32>
    %c0_211 = arith.constant 0 : index
    %c0_212 = arith.constant 0 : index
    %c0_213 = arith.constant 0 : index
    %c0_214 = arith.constant 0 : index
    %333 = vector.load %arg9[%c0_211, %c0_212, %c0_213, %c0_214] : memref<1x8x16x8xf32, #tpu.memory_space<vmem>>, vector<1x1x16x8xf32>
    %334 = vector.shape_cast %333 : vector<1x1x16x8xf32> to vector<16x8xf32>
    %335 = vector.shape_cast %332 : vector<16x8xf32> to vector<1x1x16x8xf32>
    tpu.vector_store %arg9[%c0_211, %c0_212, %c0_213, %c0_214], %335 {strides = array<i32>} : memref<1x8x16x8xf32, #tpu.memory_space<vmem>>, vector<1x1x16x8xf32>,
    %336 = vector.extract_strided_slice %319 {offsets = [1, 0, 0], sizes = [1, 16, 32], strides = [1, 1, 1]} : vector<8x16x32xf32> to vector<1x16x32xf32>
    %337 = vector.shape_cast %336 : vector<1x16x32xf32> to vector<16x32xf32>
    %cst_215 = arith.constant dense<0.000000e+00> : vector<16x8xf32>
    %338 = tpu.matmul %337, %320, %cst_215 {dimension_numbers = #tpu.dot_dimension_numbers<[1], [0], [0], [1], [0, 0, 1, 1], [], []>} : vector<16x32xf32>, vector<32x8xf32>, vector<16x8xf32> -> vector<16x8xf32>
    %339 = vector.broadcast %321 : vector<1x8xf32> to vector<16x8xf32>
    %340 = arith.addf %338, %339 : vector<16x8xf32>
    %c1_i32_216 = arith.constant 1 : i32
    %341 = arith.addi %0, %c1_i32_216 : i32
    %c1_i32_217 = arith.constant 1 : i32
    %342 = arith.addi %341, %c1_i32_217 : i32
    %c0_218 = arith.constant 0 : index
    %343 = arith.index_cast %342 : i32 to index
    %c1_219 = arith.constant 1 : index
    %c0_220 = arith.constant 0 : index
    %344 = vector.load %arg2[%c0_218, %343, %c1_219, %c0_220] : memref<1x18x18x8xf32, #tpu.memory_space<vmem>>, vector<1x1x16x8xf32>
    %345 = vector.shape_cast %344 : vector<1x1x16x8xf32> to vector<16x8xf32>
    %346 = arith.addf %340, %345 : vector<16x8xf32>
    %c0_221 = arith.constant 0 : index
    %c1_222 = arith.constant 1 : index
    %c0_223 = arith.constant 0 : index
    %c0_224 = arith.constant 0 : index
    %347 = vector.load %arg9[%c0_221, %c1_222, %c0_223, %c0_224] : memref<1x8x16x8xf32, #tpu.memory_space<vmem>>, vector<1x1x16x8xf32>
    %348 = vector.shape_cast %347 : vector<1x1x16x8xf32> to vector<16x8xf32>
    %349 = vector.shape_cast %346 : vector<16x8xf32> to vector<1x1x16x8xf32>
    tpu.vector_store %arg9[%c0_221, %c1_222, %c0_223, %c0_224], %349 {strides = array<i32>} : memref<1x8x16x8xf32, #tpu.memory_space<vmem>>, vector<1x1x16x8xf32>,
    %350 = vector.extract_strided_slice %319 {offsets = [2, 0, 0], sizes = [1, 16, 32], strides = [1, 1, 1]} : vector<8x16x32xf32> to vector<1x16x32xf32>
    %351 = vector.shape_cast %350 : vector<1x16x32xf32> to vector<16x32xf32>
    %cst_225 = arith.constant dense<0.000000e+00> : vector<16x8xf32>
    %352 = tpu.matmul %351, %320, %cst_225 {dimension_numbers = #tpu.dot_dimension_numbers<[1], [0], [0], [1], [0, 0, 1, 1], [], []>} : vector<16x32xf32>, vector<32x8xf32>, vector<16x8xf32> -> vector<16x8xf32>
    %353 = vector.broadcast %321 : vector<1x8xf32> to vector<16x8xf32>
    %354 = arith.addf %352, %353 : vector<16x8xf32>
    %c1_i32_226 = arith.constant 1 : i32
    %355 = arith.addi %0, %c1_i32_226 : i32
    %c2_i32_227 = arith.constant 2 : i32
    %356 = arith.addi %355, %c2_i32_227 : i32
    %c0_228 = arith.constant 0 : index
    %357 = arith.index_cast %356 : i32 to index
    %c1_229 = arith.constant 1 : index
    %c0_230 = arith.constant 0 : index
    %358 = vector.load %arg2[%c0_228, %357, %c1_229, %c0_230] : memref<1x18x18x8xf32, #tpu.memory_space<vmem>>, vector<1x1x16x8xf32>
    %359 = vector.shape_cast %358 : vector<1x1x16x8xf32> to vector<16x8xf32>
    %360 = arith.addf %354, %359 : vector<16x8xf32>
    %c0_231 = arith.constant 0 : index
    %c2_232 = arith.constant 2 : index
    %c0_233 = arith.constant 0 : index
    %c0_234 = arith.constant 0 : index
    %361 = vector.load %arg9[%c0_231, %c2_232, %c0_233, %c0_234] : memref<1x8x16x8xf32, #tpu.memory_space<vmem>>, vector<1x1x16x8xf32>
    %362 = vector.shape_cast %361 : vector<1x1x16x8xf32> to vector<16x8xf32>
    %363 = vector.shape_cast %360 : vector<16x8xf32> to vector<1x1x16x8xf32>
    tpu.vector_store %arg9[%c0_231, %c2_232, %c0_233, %c0_234], %363 {strides = array<i32>} : memref<1x8x16x8xf32, #tpu.memory_space<vmem>>, vector<1x1x16x8xf32>,
    %364 = vector.extract_strided_slice %319 {offsets = [3, 0, 0], sizes = [1, 16, 32], strides = [1, 1, 1]} : vector<8x16x32xf32> to vector<1x16x32xf32>
    %365 = vector.shape_cast %364 : vector<1x16x32xf32> to vector<16x32xf32>
    %cst_235 = arith.constant dense<0.000000e+00> : vector<16x8xf32>
    %366 = tpu.matmul %365, %320, %cst_235 {dimension_numbers = #tpu.dot_dimension_numbers<[1], [0], [0], [1], [0, 0, 1, 1], [], []>} : vector<16x32xf32>, vector<32x8xf32>, vector<16x8xf32> -> vector<16x8xf32>
    %367 = vector.broadcast %321 : vector<1x8xf32> to vector<16x8xf32>
    %368 = arith.addf %366, %367 : vector<16x8xf32>
    %c1_i32_236 = arith.constant 1 : i32
    %369 = arith.addi %0, %c1_i32_236 : i32
    %c3_i32_237 = arith.constant 3 : i32
    %370 = arith.addi %369, %c3_i32_237 : i32
    %c0_238 = arith.constant 0 : index
    %371 = arith.index_cast %370 : i32 to index
    %c1_239 = arith.constant 1 : index
    %c0_240 = arith.constant 0 : index
    %372 = vector.load %arg2[%c0_238, %371, %c1_239, %c0_240] : memref<1x18x18x8xf32, #tpu.memory_space<vmem>>, vector<1x1x16x8xf32>
    %373 = vector.shape_cast %372 : vector<1x1x16x8xf32> to vector<16x8xf32>
    %374 = arith.addf %368, %373 : vector<16x8xf32>
    %c0_241 = arith.constant 0 : index
    %c3_242 = arith.constant 3 : index
    %c0_243 = arith.constant 0 : index
    %c0_244 = arith.constant 0 : index
    %375 = vector.load %arg9[%c0_241, %c3_242, %c0_243, %c0_244] : memref<1x8x16x8xf32, #tpu.memory_space<vmem>>, vector<1x1x16x8xf32>
    %376 = vector.shape_cast %375 : vector<1x1x16x8xf32> to vector<16x8xf32>
    %377 = vector.shape_cast %374 : vector<16x8xf32> to vector<1x1x16x8xf32>
    tpu.vector_store %arg9[%c0_241, %c3_242, %c0_243, %c0_244], %377 {strides = array<i32>} : memref<1x8x16x8xf32, #tpu.memory_space<vmem>>, vector<1x1x16x8xf32>,
    %378 = vector.extract_strided_slice %319 {offsets = [4, 0, 0], sizes = [1, 16, 32], strides = [1, 1, 1]} : vector<8x16x32xf32> to vector<1x16x32xf32>
    %379 = vector.shape_cast %378 : vector<1x16x32xf32> to vector<16x32xf32>
    %cst_245 = arith.constant dense<0.000000e+00> : vector<16x8xf32>
    %380 = tpu.matmul %379, %320, %cst_245 {dimension_numbers = #tpu.dot_dimension_numbers<[1], [0], [0], [1], [0, 0, 1, 1], [], []>} : vector<16x32xf32>, vector<32x8xf32>, vector<16x8xf32> -> vector<16x8xf32>
    %381 = vector.broadcast %321 : vector<1x8xf32> to vector<16x8xf32>
    %382 = arith.addf %380, %381 : vector<16x8xf32>
    %c1_i32_246 = arith.constant 1 : i32
    %383 = arith.addi %0, %c1_i32_246 : i32
    %c4_i32_247 = arith.constant 4 : i32
    %384 = arith.addi %383, %c4_i32_247 : i32
    %c0_248 = arith.constant 0 : index
    %385 = arith.index_cast %384 : i32 to index
    %c1_249 = arith.constant 1 : index
    %c0_250 = arith.constant 0 : index
    %386 = vector.load %arg2[%c0_248, %385, %c1_249, %c0_250] : memref<1x18x18x8xf32, #tpu.memory_space<vmem>>, vector<1x1x16x8xf32>
    %387 = vector.shape_cast %386 : vector<1x1x16x8xf32> to vector<16x8xf32>
    %388 = arith.addf %382, %387 : vector<16x8xf32>
    %c0_251 = arith.constant 0 : index
    %c4_252 = arith.constant 4 : index
    %c0_253 = arith.constant 0 : index
    %c0_254 = arith.constant 0 : index
    %389 = vector.load %arg9[%c0_251, %c4_252, %c0_253, %c0_254] : memref<1x8x16x8xf32, #tpu.memory_space<vmem>>, vector<1x1x16x8xf32>
    %390 = vector.shape_cast %389 : vector<1x1x16x8xf32> to vector<16x8xf32>
    %391 = vector.shape_cast %388 : vector<16x8xf32> to vector<1x1x16x8xf32>
    tpu.vector_store %arg9[%c0_251, %c4_252, %c0_253, %c0_254], %391 {strides = array<i32>} : memref<1x8x16x8xf32, #tpu.memory_space<vmem>>, vector<1x1x16x8xf32>,
    %392 = vector.extract_strided_slice %319 {offsets = [5, 0, 0], sizes = [1, 16, 32], strides = [1, 1, 1]} : vector<8x16x32xf32> to vector<1x16x32xf32>
    %393 = vector.shape_cast %392 : vector<1x16x32xf32> to vector<16x32xf32>
    %cst_255 = arith.constant dense<0.000000e+00> : vector<16x8xf32>
    %394 = tpu.matmul %393, %320, %cst_255 {dimension_numbers = #tpu.dot_dimension_numbers<[1], [0], [0], [1], [0, 0, 1, 1], [], []>} : vector<16x32xf32>, vector<32x8xf32>, vector<16x8xf32> -> vector<16x8xf32>
    %395 = vector.broadcast %321 : vector<1x8xf32> to vector<16x8xf32>
    %396 = arith.addf %394, %395 : vector<16x8xf32>
    %c1_i32_256 = arith.constant 1 : i32
    %397 = arith.addi %0, %c1_i32_256 : i32
    %c5_i32_257 = arith.constant 5 : i32
    %398 = arith.addi %397, %c5_i32_257 : i32
    %c0_258 = arith.constant 0 : index
    %399 = arith.index_cast %398 : i32 to index
    %c1_259 = arith.constant 1 : index
    %c0_260 = arith.constant 0 : index
    %400 = vector.load %arg2[%c0_258, %399, %c1_259, %c0_260] : memref<1x18x18x8xf32, #tpu.memory_space<vmem>>, vector<1x1x16x8xf32>
    %401 = vector.shape_cast %400 : vector<1x1x16x8xf32> to vector<16x8xf32>
    %402 = arith.addf %396, %401 : vector<16x8xf32>
    %c0_261 = arith.constant 0 : index
    %c5_262 = arith.constant 5 : index
    %c0_263 = arith.constant 0 : index
    %c0_264 = arith.constant 0 : index
    %403 = vector.load %arg9[%c0_261, %c5_262, %c0_263, %c0_264] : memref<1x8x16x8xf32, #tpu.memory_space<vmem>>, vector<1x1x16x8xf32>
    %404 = vector.shape_cast %403 : vector<1x1x16x8xf32> to vector<16x8xf32>
    %405 = vector.shape_cast %402 : vector<16x8xf32> to vector<1x1x16x8xf32>
    tpu.vector_store %arg9[%c0_261, %c5_262, %c0_263, %c0_264], %405 {strides = array<i32>} : memref<1x8x16x8xf32, #tpu.memory_space<vmem>>, vector<1x1x16x8xf32>,
    %406 = vector.extract_strided_slice %319 {offsets = [6, 0, 0], sizes = [1, 16, 32], strides = [1, 1, 1]} : vector<8x16x32xf32> to vector<1x16x32xf32>
    %407 = vector.shape_cast %406 : vector<1x16x32xf32> to vector<16x32xf32>
    %cst_265 = arith.constant dense<0.000000e+00> : vector<16x8xf32>
    %408 = tpu.matmul %407, %320, %cst_265 {dimension_numbers = #tpu.dot_dimension_numbers<[1], [0], [0], [1], [0, 0, 1, 1], [], []>} : vector<16x32xf32>, vector<32x8xf32>, vector<16x8xf32> -> vector<16x8xf32>
    %409 = vector.broadcast %321 : vector<1x8xf32> to vector<16x8xf32>
    %410 = arith.addf %408, %409 : vector<16x8xf32>
    %c1_i32_266 = arith.constant 1 : i32
    %411 = arith.addi %0, %c1_i32_266 : i32
    %c6_i32_267 = arith.constant 6 : i32
    %412 = arith.addi %411, %c6_i32_267 : i32
    %c0_268 = arith.constant 0 : index
    %413 = arith.index_cast %412 : i32 to index
    %c1_269 = arith.constant 1 : index
    %c0_270 = arith.constant 0 : index
    %414 = vector.load %arg2[%c0_268, %413, %c1_269, %c0_270] : memref<1x18x18x8xf32, #tpu.memory_space<vmem>>, vector<1x1x16x8xf32>
    %415 = vector.shape_cast %414 : vector<1x1x16x8xf32> to vector<16x8xf32>
    %416 = arith.addf %410, %415 : vector<16x8xf32>
    %c0_271 = arith.constant 0 : index
    %c6_272 = arith.constant 6 : index
    %c0_273 = arith.constant 0 : index
    %c0_274 = arith.constant 0 : index
    %417 = vector.load %arg9[%c0_271, %c6_272, %c0_273, %c0_274] : memref<1x8x16x8xf32, #tpu.memory_space<vmem>>, vector<1x1x16x8xf32>
    %418 = vector.shape_cast %417 : vector<1x1x16x8xf32> to vector<16x8xf32>
    %419 = vector.shape_cast %416 : vector<16x8xf32> to vector<1x1x16x8xf32>
    tpu.vector_store %arg9[%c0_271, %c6_272, %c0_273, %c0_274], %419 {strides = array<i32>} : memref<1x8x16x8xf32, #tpu.memory_space<vmem>>, vector<1x1x16x8xf32>,
    %420 = vector.extract_strided_slice %319 {offsets = [7, 0, 0], sizes = [1, 16, 32], strides = [1, 1, 1]} : vector<8x16x32xf32> to vector<1x16x32xf32>
    %421 = vector.shape_cast %420 : vector<1x16x32xf32> to vector<16x32xf32>
    %cst_275 = arith.constant dense<0.000000e+00> : vector<16x8xf32>
    %422 = tpu.matmul %421, %320, %cst_275 {dimension_numbers = #tpu.dot_dimension_numbers<[1], [0], [0], [1], [0, 0, 1, 1], [], []>} : vector<16x32xf32>, vector<32x8xf32>, vector<16x8xf32> -> vector<16x8xf32>
    %423 = vector.broadcast %321 : vector<1x8xf32> to vector<16x8xf32>
    %424 = arith.addf %422, %423 : vector<16x8xf32>
    %c1_i32_276 = arith.constant 1 : i32
    %425 = arith.addi %0, %c1_i32_276 : i32
    %c7_i32_277 = arith.constant 7 : i32
    %426 = arith.addi %425, %c7_i32_277 : i32
    %c0_278 = arith.constant 0 : index
    %427 = arith.index_cast %426 : i32 to index
    %c1_279 = arith.constant 1 : index
    %c0_280 = arith.constant 0 : index
    %428 = vector.load %arg2[%c0_278, %427, %c1_279, %c0_280] : memref<1x18x18x8xf32, #tpu.memory_space<vmem>>, vector<1x1x16x8xf32>
    %429 = vector.shape_cast %428 : vector<1x1x16x8xf32> to vector<16x8xf32>
    %430 = arith.addf %424, %429 : vector<16x8xf32>
    %c0_281 = arith.constant 0 : index
    %c7_282 = arith.constant 7 : index
    %c0_283 = arith.constant 0 : index
    %c0_284 = arith.constant 0 : index
    %431 = vector.load %arg9[%c0_281, %c7_282, %c0_283, %c0_284] : memref<1x8x16x8xf32, #tpu.memory_space<vmem>>, vector<1x1x16x8xf32>
    %432 = vector.shape_cast %431 : vector<1x1x16x8xf32> to vector<16x8xf32>
    %433 = vector.shape_cast %430 : vector<16x8xf32> to vector<1x1x16x8xf32>
    tpu.vector_store %arg9[%c0_281, %c7_282, %c0_283, %c0_284], %433 {strides = array<i32>} : memref<1x8x16x8xf32, #tpu.memory_space<vmem>>, vector<1x1x16x8xf32>,
    return
  }
  func.func @transform_0(%arg0: i32, %arg1: i32) -> (i32, i32, i32, i32) {
    %c0_i32 = arith.constant 0 : i32
    %c0_i32_0 = arith.constant 0 : i32
    %c0_i32_1 = arith.constant 0 : i32
    %c0_i32_2 = arith.constant 0 : i32
    return %arg0, %c0_i32, %c0_i32_0, %c0_i32_1 : i32, i32, i32, i32
  }
  func.func @transform_1(%arg0: i32, %arg1: i32) -> (i32, i32) {
    %c0_i32 = arith.constant 0 : i32
    %c0_i32_0 = arith.constant 0 : i32
    %c0_i32_1 = arith.constant 0 : i32
    return %c0_i32, %c0_i32_0 : i32, i32
  }
  func.func @transform_2(%arg0: i32, %arg1: i32) -> (i32, i32) {
    %c0_i32 = arith.constant 0 : i32
    %c0_i32_0 = arith.constant 0 : i32
    %c0_i32_1 = arith.constant 0 : i32
    return %c0_i32, %c0_i32_0 : i32, i32
  }
  func.func @transform_3(%arg0: i32, %arg1: i32) -> (i32, i32) {
    %c0_i32 = arith.constant 0 : i32
    %c0_i32_0 = arith.constant 0 : i32
    %c0_i32_1 = arith.constant 0 : i32
    return %c0_i32, %c0_i32_0 : i32, i32
  }
  func.func @transform_4(%arg0: i32, %arg1: i32) -> (i32, i32) {
    %c0_i32 = arith.constant 0 : i32
    %c0_i32_0 = arith.constant 0 : i32
    %c0_i32_1 = arith.constant 0 : i32
    return %c0_i32, %c0_i32_0 : i32, i32
  }
  func.func @transform_5(%arg0: i32, %arg1: i32) -> (i32, i32) {
    %c0_i32 = arith.constant 0 : i32
    %c0_i32_0 = arith.constant 0 : i32
    %c0_i32_1 = arith.constant 0 : i32
    return %c0_i32, %c0_i32_0 : i32, i32
  }
  func.func @transform_6(%arg0: i32, %arg1: i32) -> (i32, i32) {
    %c0_i32 = arith.constant 0 : i32
    %c0_i32_0 = arith.constant 0 : i32
    %c0_i32_1 = arith.constant 0 : i32
    return %c0_i32, %c0_i32_0 : i32, i32
  }
  func.func @transform_7(%arg0: i32, %arg1: i32) -> (i32, i32, i32, i32) {
    %c0_i32 = arith.constant 0 : i32
    %c0_i32_0 = arith.constant 0 : i32
    %c0_i32_1 = arith.constant 0 : i32
    return %arg0, %arg1, %c0_i32, %c0_i32_0 : i32, i32, i32, i32
  }
}

</mosaic_0001>

<bundles_post_ra>
// kernel: tpu_custom_call.1
= control target key start
LH: loop header
LB: loop body
LE: loop exit
PB: predicated region body
PF: predicated region fallthrough
CT: control target
= control target key end

     0   :  { %s3661_s24 = smov 0   ;;  %s3663_s25 = smov 0   ;;  %s4924_s0 = inlined_call_operand.vmem [shape: f32[2,18,18,8], index: 0, kind: input, shape index: {}]   ;;  %s4925_s1 = inlined_call_operand.vmem [shape: f32[8,32], index: 1, kind: input, shape index: {}]   ;;  %s4926_s2 = inlined_call_operand.vmem [shape: f32[1,32], index: 2, kind: input, shape index: {}]   ;;  %s4927_s3 = inlined_call_operand.vmem [shape: f32[9,32], index: 3, kind: input, shape index: {}]   ;;  %s4928_s4 = inlined_call_operand.vmem [shape: f32[1,32], index: 4, kind: input, shape index: {}]   ;;  %s4929_s5 = inlined_call_operand.vmem [shape: f32[32,8], index: 5, kind: input, shape index: {}]   ;;  %s4930_s6 = inlined_call_operand.vmem [shape: f32[1,8], index: 6, kind: input, shape index: {}]   ;;  %s4931_s7 = inlined_call_operand.vmem [shape: f32[2,16,16,8], index: 7, kind: output, shape index: {}]  }
   0x1   :  { %s3665_s26 = smov 0   ;;  %s3667_s27 = smov 0  }
   0x2   :  { %s3669_s28 = smov 0  }
   0x3 LB: > { %s26_s29 = sadd.s32 1, %s3609_s26  ;;  %s29_s30 = sadd.s32 1, %s3613_s27  ;;  %s3617_s28 = sphi %s3669_s28, %s17_s28   ;;  %s3613_s27 = sphi %s3667_s27, %s5010_s27   ;;  %s3609_s26 = sphi %s3665_s26, %s5009_s26   ;;  %s3605_s25 = sphi %s3663_s25, %s5008_s25   ;;  %s3601_s24 = sphi %s3661_s24, %s5007_s24  }
   0x4   : > { %p27_p0 = scmp.ge.s32.totalorder %s26_s29, 2  ;;  %p3017_p1 = scmp.ge.s32.totalorder %s3617_s28, 1 }
   0x5   : > { %p251_p2 = scmp.lt.s32.totalorder %s3617_s28, 5 }
   0x6   : > { %s5012_s29 = smov (%p27_p0, %s26_s29), 0  ;;  %s5014_s30 = smov (!%p27_p0, %s29_s30), %s3613_s27 }
   0x7   : > { %p252_p3 = pnand %p3017_p1, %p251_p2  ;;  %p31_p4 = scmp.ge.s32.totalorder %s5014_s30, 2 }
   0x8   : > { %v3696_v0 = vld [vmem:[%s4925_s1] sm:$0xff] (!%p252_p3)  ;;  %p288_p5 = scmp.lt.s32.totalorder (!%p252_p3), %s3605_s25, 1  ;;  %v3619_v1 = vmov (!%p252_p3), 0.0   ;;  %vm3620_vm0 = vmmov (!%p252_p3), 0   ;;  %s3024_s10 = smul.u32 (!%p252_p3), 192, %s3601_s24  ;;  %vm331_vm1 = vcmask (!%p252_p3), 64512   ;;  %v305_v38 = vlaneseq (!%p252_p3) }
   0x9   : > { %s5016_s30 = smov (%p31_p4, %s5014_s30), 0  ;;  %255 = sbr.rel (%p252_p3) target bundleno = 586 (0x24a), region = 48 }
   0xa   : > { %3267 = vmatprep.subr.mxu0 (!%p252_p3), %v3619_v1  ;;  %3278 = vmatprep.subr.mxu1 (!%p252_p3), %v3619_v1  ;;  %v2171_v32 = vld [vmem:[%s4929_s5] sm:$0xff] (!%p252_p3)  ;;  %v2172_v33 = vld [vmem:[%s4929_s5 + $0x8] sm:$0xff] (!%p252_p3)  ;;  %v2173_v35 = vld [vmem:[%s4929_s5 + $0x10] sm:$0xff] (!%p252_p3)  ;;  %s3874_s8 = sshll.u32 (!%p252_p3), %s3601_s24, 3  ;;  %v3937_v39 = vshrl.u32 (!%p252_p3), %v305_v38, 7  ;;  %vm446_vm6 = vcmask (!%p252_p3), 261120  }
   0xb   : > { %3268 = vmatpush3.msra.mxu0 (!%p252_p3), %v3696_v0  ;;  %3269 = vmatprep.mubr.msk.f32.mxu0 (!%p252_p3), %vm3620_vm0, %v3619_v1  ;;  %v3853_v34 = vpack.c.bf16 (!%p252_p3), %v2172_v33, %v2171_v32  ;;  %v2174_v36 = vld [vmem:[%s4929_s5 + $0x18] sm:$0xff] (!%p252_p3)  ;;  %s451_s9 = sadd.s32 (!%p252_p3), 1, %s3874_s8  ;;  %p427_p6 = scmp.ge.s32.totalorder (!%p252_p3), %s3874_s8, 1  ;;  %v3950_v41 = vld [vmem:[%s4926_s2] ss:$0 sm:$0xff] (!%p252_p3)  ;;  %vm449_vm9 = vcmask (!%p252_p3), 254976  }
   0xc   : > { %3279 = vmatpush3.msra.mxu1 (!%p252_p3), %v3696_v0  ;;  %3280 = vmatprep.mubr.msk.f32.mxu1 (!%p252_p3), %vm3620_vm0, %v3619_v1  ;;  %v3865_v37 = vpack.c.bf16 (!%p252_p3), %v2174_v36, %v2173_v35  ;;  %p428_p7 = scmp.le.s32.totalorder (!%p252_p3), %s3874_s8, 16  ;;  %p560_p8 = scmp.ge.s32.totalorder (!%p252_p3), %s451_s9, 1  ;;  %vm309_vm2 = vcmp.ge.s32.totalorder (!%p252_p3), %v3937_v39, 1  ;;  %v3994_v56 = vadd.s32 (!%p252_p3), 16, %v3937_v39  ;;  %v4112_v32 = vld [vmem:[%s4927_s3 + $0x3] ss:$0 sm:$0xff] (!%p252_p3) }
   0xd   : > { %3289 = vmatprep.subr.mxu0 (!%p252_p3), %v3619_v1  ;;  %3300 = vmatprep.subr.mxu1 (!%p252_p3), %v3619_v1  ;;  %p561_p9 = scmp.le.s32.totalorder (!%p252_p3), %s451_s9, 16  ;;  %s715_s13 = sadd.s32 (!%p252_p3), 3, %s3874_s8 }
   0xe   : > { %p3879_p10 = pnand (!%p252_p3), %p428_p7, %p427_p6  ;;  %s847_s17 = sadd.s32 (!%p252_p3), 4, %s3874_s8  ;;  %vm314_vm8 = vcmp.le.s32.totalorder (!%p252_p3), %v3994_v56, 16 }
   0xf   : > { %p562_p11 = pnand (!%p252_p3), %p561_p9, %p560_p8  ;;  %p3898_p0 = scmp.ge.s32.totalorder (!%p252_p3), %s715_s13, 1 }
  0x10   : > { %s5018_s25 = smov (!%p288_p5, %s3605_s25), 1  ;;  %p3902_p1 = scmp.le.s32.totalorder %s715_s13, 16 }
  0x11   : > { %s3529_s11 = smul.u32 432, %s5018_s25  ;;  %s979_s20 = sadd.s32 5, %s3874_s8 }
  0x12   : > { %s3029_s24 = scalar_select %p3879_p10, 0, 1 }
  0x13   : > { %s292_s14 = scalar_lea.vmem %s4924_s0, %s3529_s11  ;;  %s583_s11 = sadd.s32 2, %s3874_s8 }
  0x14   : > { %s3715_s15 = scalar_lea.vmem %s292_s14, %s3024_s10  ;;  %p3889_p12 = scmp.ge.s32.totalorder %s583_s11, 1  ;;  %v3943_v40 = vstv %s3029_s24 }
  0x15   : > { %v320_v2 = vld [vmem:[%s3715_s15] sm:$0xff]  ;;  %v3032_v3 = vld [vmem:[%s3715_s15 + $0x18] sm:$0xff]  ;;  %v321_v4 = vld [vmem:[%s3715_s15 + $0x8] sm:$0xff]  ;;  %s3886_s12 = scalar_select %p562_p11, 0, 1  ;;  %vm433_vm3 = vcmp.eq.s32.totalorder %v3943_v40, 1 }
  0x16   : > { %3270 = vmatmul.mubr.msk.f32.vlgmr.msra.gmra.mrb[0].mxu0 %vm331_vm1, %v320_v2  ;;  %3281 = vmatmul.mubr.msk.f32.vlgmr.msra.gmra.mrb[0].mxu1 %vm331_vm1, %v3032_v3  ;;  %v3033_v5 = vld [vmem:[%s3715_s15 + $0x20] sm:$0xff]  ;;  %v322_v6 = vld [vmem:[%s3715_s15 + $0x10] sm:$0x3]  ;;  %v3034_v7 = vld [vmem:[%s3715_s15 + $0x28] sm:$0x3]  ;;  %p3893_p13 = scmp.le.s32.totalorder %s583_s11, 16  ;;  %p826_p7 = pnand %p3902_p1, %p3898_p0 }
  0x17   : > { %3290 = vmatpush3.msra.mxu0 %v3696_v0  ;;  %3272 = vmatprep.mubr.msk.f32.mxu0 %vm3620_vm0, %v3619_v1  ;;  %v3042_v8 = vld [vmem:[%s3715_s15 + $0x30] sm:$0xff]  ;;  %v3052_v9 = vld [vmem:[%s3715_s15 + $0x48] sm:$0xff]  ;;  %v3043_v10 = vld [vmem:[%s3715_s15 + $0x38] sm:$0xff]  ;;  %p3907_p2 = scmp.ge.s32.totalorder %s847_s17, 1  ;;  %p3911_p3 = scmp.le.s32.totalorder %s847_s17, 16  ;;  %v565_v42 = vstv %s3886_s12 }
  0x18   : > { %3283 = vmatprep.mubr.msk.f32.mxu1 %vm3620_vm0, %v3619_v1  ;;  %3301 = vmatpush3.msra.mxu1 %v3696_v0  ;;  %v3053_v11 = vld [vmem:[%s3715_s15 + $0x50] sm:$0xff]  ;;  %v3044_v12 = vld [vmem:[%s3715_s15 + $0x40] sm:$0x3]  ;;  %v3054_v13 = vld [vmem:[%s3715_s15 + $0x58] sm:$0x3]  ;;  %p694_p4 = pnand %p3893_p13, %p3889_p12  ;;  %p3919_p5 = scmp.ge.s32.totalorder %s979_s20, 1 }
  0x19   : > { %3311 = vmatprep.subr.mxu0 %v3619_v1  ;;  %3322 = vmatprep.subr.mxu1 %v3619_v1  ;;  %v3062_v14 = vld [vmem:[%s3715_s15 + $0x60] sm:$0xff]  ;;  %v3072_v15 = vld [vmem:[%s3715_s15 + $0x78] sm:$0xff]  ;;  %v3063_v16 = vld [vmem:[%s3715_s15 + $0x68] sm:$0xff]  ;;  %p3923_p6 = scmp.le.s32.totalorder %s979_s20, 16  ;;  %p958_p8 = pnand %p3911_p3, %p3907_p2  ;;  %vm3962_vm4 = vcmp.eq.s32.totalorder %v565_v42, 1 }
  0x1a   : > { %3273 = vmatmul.mubr.msk.f32.gmra.mrb[2].mxu0 %vm331_vm1, %v321_v4  ;;  %3284 = vmatmul.mubr.msk.f32.gmra.mrb[2].mxu1 %vm331_vm1, %v3033_v5  ;;  %v3073_v17 = vld [vmem:[%s3715_s15 + $0x80] sm:$0xff]  ;;  %v3064_v18 = vld [vmem:[%s3715_s15 + $0x70] sm:$0x3]  ;;  %v3074_v19 = vld [vmem:[%s3715_s15 + $0x88] sm:$0x3]  ;;  %s1111_s17 = sadd.s32 6, %s3874_s8 }
  0x1b   : > { %3275 = vmatprep.mubr.msk.f32.mxu0 %vm3620_vm0, %v3619_v1  ;;  %3286 = vmatprep.mubr.msk.f32.mxu1 %vm3620_vm0, %v3619_v1  ;;  %v3082_v20 = vld [vmem:[%s3715_s15 + $0x90] sm:$0xff]  ;;  %v3092_v21 = vld [vmem:[%s3715_s15 + $0xa8] sm:$0xff]  ;;  %v3083_v22 = vld [vmem:[%s3715_s15 + $0x98] sm:$0xff]  ;;  %s3935_s10 = scalar_select %p694_p4, 0, 1 }
  0x1c   : > { %v3093_v23 = vld [vmem:[%s3715_s15 + $0xb0] sm:$0xff]  ;;  %v3084_v24 = vld [vmem:[%s3715_s15 + $0xa0] sm:$0x3]  ;;  %v3094_v25 = vld [vmem:[%s3715_s15 + $0xb8] sm:$0x3]  ;;  %p1090_p9 = pnand %p3923_p6, %p3919_p5  ;;  %s1243_s12 = sadd.s32 7, %s3874_s8 }
  0x1d   : > { %v3102_v26 = vld [vmem:[%s3715_s15 + $0xc0] sm:$0xff]  ;;  %v3112_v27 = vld [vmem:[%s3715_s15 + $0xd8] sm:$0xff]  ;;  %v3103_v28 = vld [vmem:[%s3715_s15 + $0xc8] sm:$0xff]  ;;  %s3945_s11 = scalar_select %p826_p7, 0, 1  ;;  %v697_v5 = vstv %s3935_s10 }
  0x1e   : > { %3276 = vmatmul.mubr.msk.f32.gmra.mrb[4].mxu0 %vm331_vm1, %v322_v6  ;;  %3287 = vmatmul.mubr.msk.f32.gmra.mrb[4].mxu1 %vm331_vm1, %v3034_v7  ;;  %v3113_v29 = vld [vmem:[%s3715_s15 + $0xe0] sm:$0xff]  ;;  %v3104_v30 = vld [vmem:[%s3715_s15 + $0xd0] sm:$0x3]  ;;  %v3114_v31 = vld [vmem:[%s3715_s15 + $0xe8] sm:$0x3]  ;;  %p3967_p10 = scmp.ge.s32.totalorder %s1111_s17, 1 }
  0x1f   : > { %3291 = vmatprep.mubr.msk.f32.mxu0 %vm3620_vm0, %v3619_v1  ;;  %3302 = vmatprep.mubr.msk.f32.mxu1 %vm3620_vm0, %v3619_v1  ;;  %s3953_s16 = scalar_select %p958_p8, 0, 1  ;;  %vm3976_vm5 = vmand %vm433_vm3, %vm309_vm2  ;;  %v829_v6 = vstv %s3945_s11  ;;  %vm4078_vm12 = vcmp.eq.s32.totalorder %v697_v5, 1 }
  0x20   : > { %s3958_s24 = scalar_select %p1090_p9, 0, 1  ;;  %vm3989_vm7 = vmand %vm3962_vm4, %vm309_vm2  ;;  %vm4082_vm13 = vcmp.eq.s32.totalorder %v829_v6, 1 }
  0x21   : > { %s1375_s19 = sadd.s32 8, %s3874_s8  ;;  %p3980_p11 = scmp.le.s32.totalorder %s1111_s17, 16  ;;  %vm4057_vm10 = vmand %vm433_vm3, %vm314_vm8 }
  0x22   : > { %3292 = vmatmul.mubr.msk.f32.vlgmr.msra.gmra.mrb[6].mxu0 %vm331_vm1, %v3042_v8  ;;  %3303 = vmatmul.mubr.msk.f32.vlgmr.msra.gmra.mrb[6].mxu1 %vm331_vm1, %v3052_v9  ;;  %s1507_s21 = sadd.s32 9, %s3874_s8  ;;  %p3996_p12 = scmp.ge.s32.totalorder %s1243_s12, 1  ;;  %vm4074_vm11 = vmand %vm3962_vm4, %vm314_vm8 }
  0x23   : > { %3312 = vmatpush3.msra.mxu0 %v3696_v0  ;;  %3294 = vmatprep.mubr.msk.f32.mxu0 %vm3620_vm0, %v3619_v1  ;;  %p4000_p13 = scmp.le.s32.totalorder %s1243_s12, 16  ;;  %p4006_p0 = scmp.ge.s32.totalorder %s1375_s19, 1  ;;  %vm4129_vm14 = vmand %vm4078_vm12, %vm309_vm2 }
  0x24   : > { %3305 = vmatprep.mubr.msk.f32.mxu1 %vm3620_vm0, %v3619_v1  ;;  %3323 = vmatpush3.msra.mxu1 %v3696_v0  ;;  %p4010_p1 = scmp.le.s32.totalorder %s1375_s19, 16  ;;  %p4014_p2 = scmp.ge.s32.totalorder %s1507_s21, 1  ;;  %vm4139_vm15 = vmand %vm4082_vm13, %vm309_vm2 }
  0x25   : > { %3333 = vmatprep.subr.mxu0 %v3619_v1  ;;  %3344 = vmatprep.subr.mxu1 %v3619_v1  ;;  %p4018_p3 = scmp.le.s32.totalorder %s1507_s21, 16  ;;  %p1222_p4 = pnand %p3980_p11, %p3967_p10 }
  0x26   : > { %3295 = vmatmul.mubr.msk.f32.gmra.mrb[8].mxu0 %vm331_vm1, %v3043_v10  ;;  %3306 = vmatmul.mubr.msk.f32.gmra.mrb[8].mxu1 %vm331_vm1, %v3053_v11  ;;  %p1354_p5 = pnand %p4000_p13, %p3996_p12  ;;  %p1486_p6 = pnand %p4010_p1, %p4006_p0 }
  0x27   : > { %3297 = vmatprep.mubr.msk.f32.mxu0 %vm3620_vm0, %v3619_v1  ;;  %3308 = vmatprep.mubr.msk.f32.mxu1 %vm3620_vm0, %v3619_v1  ;;  %p1618_p7 = pnand %p4018_p3, %p4014_p2  ;;  %p296_p8 = scmp.lt.s32.totalorder %s3874_s8, 15 }
  0x28   : > { %s4066_s10 = scalar_select %p1222_p4, 0, 1 }
  0x29   : > { %s4092_s11 = scalar_select %p1354_p5, 0, 1 }
  0x2a   : > { %3298 = vmatmul.mubr.msk.f32.gmra.mrb[10].mxu0 %vm331_vm1, %v3044_v12  ;;  %3309 = vmatmul.mubr.msk.f32.gmra.mrb[10].mxu1 %vm331_vm1, %v3054_v13  ;;  %s4101_s12 = scalar_select %p1486_p6, 0, 1 }
  0x2b   : > { %3313 = vmatprep.mubr.msk.f32.mxu0 %vm3620_vm0, %v3619_v1  ;;  %3324 = vmatprep.mubr.msk.f32.mxu1 %vm3620_vm0, %v3619_v1  ;;  %s4119_s21 = scalar_select %p1618_p7, 0, 1  ;;  %v1357_v48 = vstv %s4092_s11 }
  0x2c   : > { %s5020_s8 = smov (!%p296_p8, %s3874_s8), 15 }
  0x2d   : > { %s3020_s23 = sshll.u32 %s5020_s8, 1 }
  0x2e   : > { %3314 = vmatmul.mubr.msk.f32.vlgmr.msra.gmra.mrb[12].mxu0 %vm331_vm1, %v3062_v14  ;;  %3325 = vmatmul.mubr.msk.f32.vlgmr.msra.gmra.mrb[12].mxu1 %vm331_vm1, %v3072_v15 }
  0x2f   : > { %3334 = vmatpush3.msra.mxu0 %v3696_v0  ;;  %3316 = vmatprep.mubr.msk.f32.mxu0 %vm3620_vm0, %v3619_v1 }
  0x30   : > { %3327 = vmatprep.mubr.msk.f32.mxu1 %vm3620_vm0, %v3619_v1  ;;  %3345 = vmatpush3.msra.mxu1 %v3696_v0 }
  0x31   : > { %3355 = vmatprep.subr.mxu0 %v3619_v1  ;;  %3366 = vmatprep.subr.mxu1 %v3619_v1 }
  0x32   : > { %3317 = vmatmul.mubr.msk.f32.gmra.mrb[14].mxu0 %vm331_vm1, %v3063_v16  ;;  %3328 = vmatmul.mubr.msk.f32.gmra.mrb[14].mxu1 %vm331_vm1, %v3073_v17 }
  0x33   : > { %3319 = vmatprep.mubr.msk.f32.mxu0 %vm3620_vm0, %v3619_v1  ;;  %3330 = vmatprep.mubr.msk.f32.mxu1 %vm3620_vm0, %v3619_v1 }
  0x36   : > { %3320 = vmatmul.mubr.msk.f32.gmra.mrb[16].mxu0 %vm331_vm1, %v3064_v18  ;;  %3331 = vmatmul.mubr.msk.f32.gmra.mrb[16].mxu1 %vm331_vm1, %v3074_v19 }
  0x37   : > { %3335 = vmatprep.mubr.msk.f32.mxu0 %vm3620_vm0, %v3619_v1  ;;  %3346 = vmatprep.mubr.msk.f32.mxu1 %vm3620_vm0, %v3619_v1 }
  0x3a   : > { %3336 = vmatmul.mubr.msk.f32.vlgmr.msra.gmra.mrb[18].mxu0 %vm331_vm1, %v3082_v20  ;;  %3347 = vmatmul.mubr.msk.f32.vlgmr.msra.gmra.mrb[18].mxu1 %vm331_vm1, %v3092_v21 }
  0x3b   : > { %3356 = vmatpush3.msra.mxu0 %v3696_v0  ;;  %3338 = vmatprep.mubr.msk.f32.mxu0 %vm3620_vm0, %v3619_v1 }
  0x3c   : > { %3349 = vmatprep.mubr.msk.f32.mxu1 %vm3620_vm0, %v3619_v1  ;;  %3367 = vmatpush3.msra.mxu1 %v3696_v0 }
  0x3d   : > { %3466 = vmatprep.subr.bf16.mxu0 %v3853_v34  ;;  %3474 = vmatprep.subr.bf16.mxu1 %v3853_v34 }
  0x3e   : > { %3339 = vmatmul.mubr.msk.f32.gmra.mrb[20].mxu0 %vm331_vm1, %v3083_v22  ;;  %3350 = vmatmul.mubr.msk.f32.gmra.mrb[20].mxu1 %vm331_vm1, %v3093_v23  ;;  %v961_v23 = vstv %s3953_s16 }
  0x3f   : > { %3341 = vmatprep.mubr.msk.f32.mxu0 %vm3620_vm0, %v3619_v1  ;;  %3352 = vmatprep.mubr.msk.f32.mxu1 %vm3620_vm0, %v3619_v1 }
  0x42   : > { %3342 = vmatmul.mubr.msk.f32.gmra.mrb[22].mxu0 %vm331_vm1, %v3084_v24  ;;  %3353 = vmatmul.mubr.msk.f32.gmra.mrb[22].mxu1 %vm331_vm1, %v3094_v25 }
  0x43   : > { %3357 = vmatprep.mubr.msk.f32.mxu0 %vm3620_vm0, %v3619_v1  ;;  %3368 = vmatprep.mubr.msk.f32.mxu1 %vm3620_vm0, %v3619_v1 }
  0x46   : > { %3358 = vmatmul.mubr.msk.f32.vlgmr.msra.gmra.mrb[24].mxu0 %vm331_vm1, %v3102_v26  ;;  %3369 = vmatmul.mubr.msk.f32.vlgmr.msra.gmra.mrb[24].mxu1 %vm331_vm1, %v3112_v27 }
  0x47   : > { %3360 = vmatprep.mubr.msk.f32.mxu0 %vm3620_vm0, %v3619_v1  ;;  %3371 = vmatprep.mubr.msk.f32.mxu1 %vm3620_vm0, %v3619_v1 }
  0x48   : > { %3468 = vmatpush3.bf16.msra.mxu0 %v3853_v34  ;;  %3476 = vmatpush3.bf16.msra.mxu1 %v3853_v34 }
  0x49   : > { %3470 = vmatprep.subr.bf16.mxu0 %v3865_v37  ;;  %3478 = vmatprep.subr.bf16.mxu1 %v3865_v37 }
  0x4a   : > { %3361 = vmatmul.mubr.msk.f32.gmra.mrb[26].mxu0 %vm331_vm1, %v3103_v28  ;;  %3372 = vmatmul.mubr.msk.f32.gmra.mrb[26].mxu1 %vm331_vm1, %v3113_v29 }
  0x4b   : > { %3363 = vmatprep.mubr.msk.f32.mxu0 %vm3620_vm0, %v3619_v1  ;;  %3374 = vmatprep.mubr.msk.f32.mxu1 %vm3620_vm0, %v3619_v1  ;;  %vm4143_vm0 = vcmp.eq.s32.totalorder %v961_v23, 1 }
  0x4c   : > { %3472 = vmatpush3.bf16.msra.mxu0 %v3865_v37  ;;  %3480 = vmatpush3.bf16.msra.mxu1 %v3865_v37 }
  0x4d   : > { %3482 = vmatprep.subr.bf16.mxu0 %v3853_v34  ;;  %3490 = vmatprep.subr.bf16.mxu1 %v3853_v34 }
  0x4e   : > { %3364 = vmatmul.mubr.msk.f32.gmra.mrb[28].mxu0 %vm331_vm1, %v3104_v30  ;;  %3375 = vmatmul.mubr.msk.f32.gmra.mrb[28].mxu1 %vm331_vm1, %v3114_v31  ;;  %v1093_v30 = vstv %s3958_s24  ;;  %v4107_v31 = vld [vmem:[%s4927_s3] ss:$0 sm:$0xff] }
  0xe9   : > { %v407_v43 = vpop.f32.mrb[0].mxu0  ;;  %v540_v44 = vpop.f32.mrb[0].mxu1 }
  0xea   : > { %v408_v45 = vadd.f32 %v3950_v41, %v407_v43  ;;  %v3271_v46 = vpop.f32.mrb[1].mxu0  ;;  %v541_v47 = vadd.f32 %v3950_v41, %v540_v44  ;;  %v3282_v49 = vpop.f32.mrb[1].mxu1 }
  0xec   : > { %v421_v50 = vmax.f32 %v408_v45, 0.0  ;;  %v554_v52 = vmax.f32 %v541_v47, 0.0  ;;  %v1225_v47 = vstv %s4066_s10 }
  0xed   : > { %v412_v54 = vpop.f32.mrb[2].mxu0  ;;  %v545_v55 = vpop.f32.mrb[2].mxu1 }
  0xee   : > { %v424_v57 = vmin.f32 %v421_v50, 6.0  ;;  %v557_v58 = vmin.f32 %v554_v52, 6.0  ;;  %v413_v59 = vadd.f32 %v3950_v41, %v412_v54  ;;  %v546_v60 = vadd.f32 %v3950_v41, %v545_v55  ;;  %v3274_v61 = vpop.f32.mrb[3].mxu0  ;;  %v3285_v62 = vpop.f32.mrb[3].mxu1 }
  0xef   : > { %v4172_v62 = vld [vmem:[%s4927_s3 + $0x4] ss:$0 sm:$0xff] }
  0xf0   : > { %v443_v63 = vsel %vm3976_vm5, %v424_v57, 0.0  ;;  %v576_v0 = vsel %vm3989_vm7, %v557_v58, 0.0  ;;  %v422_v1 = vmax.f32 %v413_v59, 0.0  ;;  %v555_v2 = vmax.f32 %v546_v60, 0.0  ;;  %v4158_v57 = vld [vmem:[%s4927_s3 + $0x1] ss:$0 sm:$0xff]  ;;  %vm4223_vm5 = vmand %vm4082_vm13, %vm314_vm8 }
  0xf1   : > { %447 = vst.msk [vmem:[#allocation2] sm:$0xff] %vm446_vm6, %v443_v63  ;;  %580 = vst.msk [vmem:[#allocation2 + $0x18] sm:$0xff] %vm446_vm6, %v576_v0  ;;  %v417_v3 = vpop.f32.mrb[4].mxu0  ;;  %v550_v4 = vpop.f32.mrb[4].mxu1  ;;  %v4163_v58 = vld [vmem:[%s4927_s3 + $0x2] ss:$0 sm:$0xff]  ;;  %v1489_v0 = vstv %s4101_s12 }
  0xf2   : > { %v425_v7 = vmin.f32 %v422_v1, 6.0  ;;  %v558_v8 = vmin.f32 %v555_v2, 6.0  ;;  %v418_v9 = vadd.f32 %v3950_v41, %v417_v3  ;;  %v551_v10 = vadd.f32 %v3950_v41, %v550_v4  ;;  %v3277_v11 = vpop.f32.mrb[5].mxu0  ;;  %v3288_v12 = vpop.f32.mrb[5].mxu1  ;;  %v4177_v63 = vld [vmem:[%s4927_s3 + $0x5] ss:$0 sm:$0xff]  ;;  %vm4251_vm7 = vmand %vm4143_vm0, %vm309_vm2 }
  0xf3   : > { %v1621_v1 = vstv %s4119_s21  ;;  %s3021_s12 = sshll.u32 %s5018_s25, 5 }
  0xf4   : > { %v444_v13 = vsel %vm433_vm3, %v425_v7, 0.0  ;;  %v577_v14 = vsel %vm3962_vm4, %v558_v8, 0.0  ;;  %v423_v15 = vmax.f32 %v418_v9, 0.0  ;;  %v556_v17 = vmax.f32 %v551_v10, 0.0  ;;  %vm4213_vm4 = vmand %vm4078_vm12, %vm314_vm8  ;;  %s300_s21 = sadd.s32 %s3021_s12, %s3020_s23 }
  0xf5   : > { %448 = vst.msk [vmem:[#allocation2 + $0x8] sm:$0xff] %vm446_vm6, %v444_v13  ;;  %581 = vst.msk [vmem:[#allocation2 + $0x20] sm:$0xff] %vm446_vm6, %v577_v14  ;;  %v672_v19 = vpop.f32.mrb[6].mxu0  ;;  %v804_v21 = vpop.f32.mrb[6].mxu1  ;;  %vm4151_vm3 = vcmp.eq.s32.totalorder %v1093_v30, 1  ;;  %s3022_s14 = sshll.u32 %s300_s21, 3 }
  0xf6   : > { %v426_v24 = vmin.f32 %v423_v15, 6.0  ;;  %v559_v25 = vmin.f32 %v556_v17, 6.0  ;;  %v673_v26 = vadd.f32 %v3950_v41, %v672_v19  ;;  %v3293_v27 = vpop.f32.mrb[7].mxu0  ;;  %v805_v28 = vadd.f32 %v3950_v41, %v804_v21  ;;  %v3304_v29 = vpop.f32.mrb[7].mxu1  ;;  %s4846_s8 = scalar_lea.vmem %s4931_s7, %s3022_s14 }
  0xf8   : > { %v445_v33 = vsel %vm4057_vm10, %v426_v24, 0.0  ;;  %v578_v35 = vsel %vm4074_vm11, %v559_v25, 0.0  ;;  %v686_v36 = vmax.f32 %v673_v26, 0.0  ;;  %v818_v40 = vmax.f32 %v805_v28, 0.0  ;;  %v1639_v42 = vld [vmem:[#allocation2] sm:$0xff]  ;;  %v1798_v59 = vld [vmem:[#allocation2 + $0x18] sm:$0xff]  ;;  %vm4263_vm10 = vmand %vm4151_vm3, %vm309_vm2 }
  0xf9   : > { %450 = vst.msk [vmem:[#allocation2 + $0x10] sm:$0x3] %vm449_vm9, %v445_v33  ;;  %582 = vst.msk [vmem:[#allocation2 + $0x28] sm:$0x3] %vm449_vm9, %v578_v35  ;;  %v677_v44 = vpop.f32.mrb[8].mxu0  ;;  %v809_v45 = vpop.f32.mrb[8].mxu1  ;;  %v1660_v60 = vmul.f32 %v4107_v31, %v1639_v42  ;;  %v4167_v61 = vmul.f32 %v4112_v32, %v1798_v59  ;;  %v1662_v14 = vmul.f32 %v4107_v31, %v1798_v59 }
  0xfa   : > { %v689_v49 = vmin.f32 %v686_v36, 6.0  ;;  %v821_v50 = vmin.f32 %v818_v40, 6.0  ;;  %v678_v51 = vadd.f32 %v3950_v41, %v677_v44  ;;  %v810_v52 = vadd.f32 %v3950_v41, %v809_v45  ;;  %v3296_v53 = vpop.f32.mrb[9].mxu0  ;;  %v3307_v54 = vpop.f32.mrb[9].mxu1 }
  0xfb   : > { %vm4269_vm11 = vcmp.eq.s32.totalorder %v1225_v47, 1 }
  0xfc   : > { %v1640_v2 = vld [vmem:[#allocation2 + $0x8] sm:$0xff]  ;;  %v1642_v3 = vld [vmem:[#allocation2 + $0x20] sm:$0xff]  ;;  %v708_v4 = vsel %vm4129_vm14, %v689_v49, 0.0  ;;  %v840_v5 = vsel %vm4139_vm15, %v821_v50, 0.0  ;;  %v687_v6 = vmax.f32 %v678_v51, 0.0  ;;  %v819_v7 = vmax.f32 %v810_v52, 0.0  ;;  %vm4341_vm14 = vmand %vm4151_vm3, %vm314_vm8 }
  0xfd   : > { %712 = vst.msk [vmem:[#allocation2 + $0x30] sm:$0xff] %vm446_vm6, %v708_v4  ;;  %844 = vst.msk [vmem:[#allocation2 + $0x48] sm:$0xff] %vm446_vm6, %v840_v5  ;;  %v682_v8 = vpop.f32.mrb[10].mxu0  ;;  %v814_v9 = vpop.f32.mrb[10].mxu1  ;;  %v1692_v10 = vld [vmem:[#allocation2 + $0x1] sm:$0xff]  ;;  %v1661_v12 = vmul.f32 %v4107_v31, %v1640_v2  ;;  %v4189_v13 = vmul.f32 %v4112_v32, %v1642_v3  ;;  %v4193_v15 = vmul.f32 %v4107_v31, %v1642_v3  ;;  %v1851_v24 = vld [vmem:[#allocation2 + $0x19] sm:$0xff] }
  0xfe   : > { %v1745_v11 = vld [vmem:[#allocation2 + $0x2] sm:$0xff]  ;;  %v690_v16 = vmin.f32 %v687_v6, 6.0  ;;  %v822_v17 = vmin.f32 %v819_v7, 6.0  ;;  %v683_v18 = vadd.f32 %v3950_v41, %v682_v8  ;;  %v815_v19 = vadd.f32 %v3950_v41, %v814_v9  ;;  %v3299_v21 = vpop.f32.mrb[11].mxu0  ;;  %v3310_v23 = vpop.f32.mrb[11].mxu1  ;;  %v1904_v25 = vld [vmem:[#allocation2 + $0x1a] sm:$0xff]  ;;  %vm4366_vm15 = vmand %vm4269_vm11, %vm309_vm2 }
  0xff   : > { %v1713_v26 = vmul.f32 %v4158_v57, %v1692_v10  ;;  %v1766_v27 = vmul.f32 %v4163_v58, %v1745_v11  ;;  %v1872_v28 = vmul.f32 %v4172_v62, %v1851_v24  ;;  %v4201_v29 = vmul.f32 %v4177_v63, %v1904_v25 }
 0x100   : > { %v1693_v30 = vld [vmem:[#allocation2 + $0x9] sm:$0xff]  ;;  %v4203_v33 = vld [vmem:[#allocation2 + $0x21] sm:$0xff]  ;;  %v709_v35 = vsel %vm4078_vm12, %v690_v16, 0.0  ;;  %v841_v36 = vsel %vm4082_vm13, %v822_v17, 0.0  ;;  %v688_v38 = vmax.f32 %v683_v18, 0.0  ;;  %v820_v42 = vmax.f32 %v815_v19, 0.0  ;;  %vm4327_vm13 = vmand %vm4143_vm0, %vm314_vm8 }
 0x101   : > { %713 = vst.msk [vmem:[#allocation2 + $0x38] sm:$0xff] %vm446_vm6, %v709_v35  ;;  %845 = vst.msk [vmem:[#allocation2 + $0x50] sm:$0xff] %vm446_vm6, %v841_v36  ;;  %v936_v44 = vpop.f32.mrb[12].mxu0  ;;  %v1068_v45 = vpop.f32.mrb[12].mxu1  ;;  %v1729_v20 = vadd.f32 %v1713_v26, %v1660_v60  ;;  %v1714_v49 = vmul.f32 %v4158_v57, %v1693_v30  ;;  %v1746_v50 = vld [vmem:[#allocation2 + $0xa] sm:$0xff]  ;;  %v1873_v51 = vmul.f32 %v4172_v62, %v4203_v33  ;;  %v4230_v52 = vld [vmem:[#allocation2 + $0x22] sm:$0xff] }
 0x102   : > { %v1715_v53 = vmul.f32 %v4158_v57, %v1851_v24  ;;  %v691_v54 = vmin.f32 %v688_v38, 6.0  ;;  %v823_v59 = vmin.f32 %v820_v42, 6.0  ;;  %v937_v22 = vadd.f32 %v3950_v41, %v936_v44  ;;  %v3315_v2 = vpop.f32.mrb[13].mxu0  ;;  %v3326_v4 = vpop.f32.mrb[13].mxu1  ;;  %v4238_v60 = vld [vmem:[%s4927_s3 + $0x6] ss:$0 sm:$0xff] }
 0x103   : > { %v1069_v3 = vadd.f32 %v3950_v41, %v1068_v45  ;;  %v1782_v5 = vadd.f32 %v1766_v27, %v1729_v20  ;;  %v1730_v6 = vadd.f32 %v1714_v49, %v1661_v12  ;;  %v1767_v7 = vmul.f32 %v4163_v58, %v1746_v50  ;;  %v4279_v27 = vld [vmem:[%s4927_s3 + $0x7] ss:$0 sm:$0xff]  ;;  %v4292_v44 = vld [vmem:[%s4927_s3 + $0x8] ss:$0 sm:$0xff] }
 0x104   : > { %v1926_v8 = vmul.f32 %v4177_v63, %v4230_v52  ;;  %v710_v9 = vsel %vm4213_vm4, %v691_v54, 0.0  ;;  %v842_v10 = vsel %vm4223_vm5, %v823_v59, 0.0  ;;  %v950_v11 = vmax.f32 %v937_v22, 0.0  ;;  %v4255_v17 = vld [vmem:[#allocation2 + $0x30] sm:$0xff]  ;;  %vm4429_vm5 = vmand %vm4269_vm11, %vm314_vm8 }
 0x105   : > { %v1082_v12 = vmax.f32 %v1069_v3, 0.0  ;;  %714 = vst.msk [vmem:[#allocation2 + $0x40] sm:$0x3] %vm449_vm9, %v710_v9  ;;  %846 = vst.msk [vmem:[#allocation2 + $0x58] sm:$0x3] %vm449_vm9, %v842_v10  ;;  %v941_v19 = vpop.f32.mrb[14].mxu0  ;;  %v1835_v24 = vadd.f32 %v4167_v61, %v1782_v5  ;;  %v1978_v26 = vmul.f32 %v4238_v60, %v4255_v17  ;;  %v1783_v30 = vadd.f32 %v1767_v7, %v1730_v6 }
 0x106   : > { %v1073_v21 = vpop.f32.mrb[14].mxu1  ;;  %v1731_v35 = vadd.f32 %v1715_v53, %v1662_v14  ;;  %v953_v36 = vmin.f32 %v950_v11, 6.0  ;;  %v942_v40 = vadd.f32 %v3950_v41, %v941_v19  ;;  %v3318_v42 = vpop.f32.mrb[15].mxu0  ;;  %vm4285_vm12 = vcmp.eq.s32.totalorder %v1357_v48, 1 }
 0x107   : > { %v1085_v38 = vmin.f32 %v1082_v12, 6.0  ;;  %v1074_v47 = vadd.f32 %v3950_v41, %v1073_v21  ;;  %v3329_v43 = vpop.f32.mrb[15].mxu1  ;;  %v1888_v45 = vadd.f32 %v1872_v28, %v1835_v24  ;;  %v1836_v14 = vadd.f32 %v4189_v13, %v1783_v30 }
 0x108   : > { %v1768_v20 = vmul.f32 %v4163_v58, %v1904_v25  ;;  %v1821_v49 = vmul.f32 %v4112_v32, %v4255_v17  ;;  %v972_v50 = vsel %vm4251_vm7, %v953_v36, 0.0  ;;  %v951_v53 = vmax.f32 %v942_v40, 0.0  ;;  %v4302_v59 = vld [vmem:[#allocation2 + $0x31] sm:$0xff]  ;;  %vm4439_vm7 = vmand %vm4285_vm12, %vm314_vm8 }
 0x109   : > { %v1104_v48 = vsel %vm4263_vm10, %v1085_v38, 0.0  ;;  %v1083_v54 = vmax.f32 %v1074_v47, 0.0  ;;  %v4304_v22 = vld [vmem:[#allocation2 + $0x32] sm:$0xff]  ;;  %976 = vst.msk [vmem:[#allocation2 + $0x60] sm:$0xff] %vm446_vm6, %v972_v50  ;;  %v946_v13 = vpop.f32.mrb[16].mxu0  ;;  %v1078_v25 = vpop.f32.mrb[16].mxu1  ;;  %v1941_v28 = vadd.f32 %v4201_v29, %v1888_v45  ;;  %v2031_v2 = vmul.f32 %v4279_v27, %v4302_v59 }
 0x10a   : > { %1108 = vst.msk [vmem:[#allocation2 + $0x78] sm:$0xff] %vm446_vm6, %v1104_v48  ;;  %v2084_v3 = vmul.f32 %v4292_v44, %v4304_v22  ;;  %v1889_v4 = vadd.f32 %v1873_v51, %v1836_v14  ;;  %v4313_v5 = vld [vmem:[#allocation2 + $0x38] sm:$0xff]  ;;  %v954_v6 = vmin.f32 %v951_v53, 6.0  ;;  %v947_v9 = vadd.f32 %v3950_v41, %v946_v13  ;;  %v3321_v11 = vpop.f32.mrb[17].mxu0  ;;  %v3332_v16 = vpop.f32.mrb[17].mxu1 }
 0x10b   : > { %v1086_v7 = vmin.f32 %v1083_v54, 6.0  ;;  %v1079_v10 = vadd.f32 %v3950_v41, %v1078_v25  ;;  %v1994_v12 = vadd.f32 %v1978_v26, %v1941_v28  ;;  %v1979_v29 = vmul.f32 %v4238_v60, %v4313_v5  ;;  %v4354_v53 = vld [vmem:[%s4928_s4] ss:$0 sm:$0xff] }
 0x10c   : > { %v1942_v18 = vadd.f32 %v1926_v8, %v1889_v4  ;;  %v1784_v19 = vadd.f32 %v1768_v20, %v1731_v35  ;;  %v973_v21 = vsel %vm4143_vm0, %v954_v6, 0.0  ;;  %v952_v24 = vmax.f32 %v947_v9, 0.0  ;;  %v4331_v26 = vld [vmem:[#allocation2 + $0x39] sm:$0xff]  ;;  %vm4376_vm0 = vmand %vm4285_vm12, %vm309_vm2  ;;  %v4391_v35 = vld [vmem:[#allocation2 + $0x48] sm:$0xff] }
 0x10d   : > { %v1105_v51 = vsel %vm4151_vm3, %v1086_v7, 0.0  ;;  %v1084_v8 = vmax.f32 %v1079_v10, 0.0  ;;  %v4333_v36 = vld [vmem:[#allocation2 + $0x3a] sm:$0xff]  ;;  %977 = vst.msk [vmem:[#allocation2 + $0x68] sm:$0xff] %vm446_vm6, %v973_v21  ;;  %v1200_v46 = vpop.f32.mrb[18].mxu0  ;;  %v1332_v38 = vpop.f32.mrb[18].mxu1  ;;  %v2047_v40 = vadd.f32 %v2031_v2, %v1994_v12  ;;  %v2032_v42 = vmul.f32 %v4279_v27, %v4331_v26 }
 0x10e   : > { %1109 = vst.msk [vmem:[#allocation2 + $0x80] sm:$0xff] %vm446_vm6, %v1105_v51  ;;  %v1995_v47 = vadd.f32 %v1979_v29, %v1942_v18  ;;  %v2085_v43 = vmul.f32 %v4292_v44, %v4333_v36  ;;  %v955_v45 = vmin.f32 %v952_v24, 6.0  ;;  %v1201_v20 = vadd.f32 %v3950_v41, %v1200_v46  ;;  %v3337_v50 = vpop.f32.mrb[19].mxu0  ;;  %v3348_v48 = vpop.f32.mrb[19].mxu1 }
 0x10f   : > { %v1087_v14 = vmin.f32 %v1084_v8, 6.0  ;;  %v1333_v55 = vadd.f32 %v3950_v41, %v1332_v38  ;;  %v2100_v54 = vadd.f32 %v2084_v3, %v2047_v40  ;;  %v1837_v25 = vadd.f32 %v1821_v49, %v1784_v19 }
 0x110   : > { %v2048_v13 = vadd.f32 %v2032_v42, %v1995_v47  ;;  %v1874_v28 = vmul.f32 %v4172_v62, %v4302_v59  ;;  %v974_v2 = vsel %vm4327_vm13, %v955_v45, 0.0  ;;  %v1214_v6 = vmax.f32 %v1201_v20, 0.0  ;;  %v4406_v20 = vld [vmem:[#allocation2 + $0x49] sm:$0xff] }
 0x111   : > { %v1106_v4 = vsel %vm4341_vm14, %v1087_v14, 0.0  ;;  %v1346_v3 = vmax.f32 %v1333_v55, 0.0  ;;  %978 = vst.msk [vmem:[#allocation2 + $0x70] sm:$0x3] %vm449_vm9, %v974_v2  ;;  %v1205_v9 = vpop.f32.mrb[20].mxu0  ;;  %v1337_v10 = vpop.f32.mrb[20].mxu1  ;;  %v2123_v11 = vadd.f32 %v4354_v53, %v2100_v54  ;;  %v1927_v29 = vmul.f32 %v4177_v63, %v4304_v22 }
 0x112   : > { %1110 = vst.msk [vmem:[#allocation2 + $0x88] sm:$0x3] %vm449_vm9, %v1106_v4  ;;  %vm4383_vm3 = vcmp.eq.s32.totalorder %v1489_v0, 1  ;;  %v2101_v12 = vadd.f32 %v2085_v43, %v2048_v13  ;;  %v1890_v18 = vadd.f32 %v1874_v28, %v1837_v25  ;;  %v1217_v19 = vmin.f32 %v1214_v6, 6.0  ;;  %v3340_v30 = vpop.f32.mrb[21].mxu0  ;;  %v3351_v8 = vpop.f32.mrb[21].mxu1 }
 0x113   : > { %v1349_v21 = vmin.f32 %v1346_v3, 6.0  ;;  %v1206_v51 = vadd.f32 %v3950_v41, %v1205_v9  ;;  %v1338_v24 = vadd.f32 %v3950_v41, %v1337_v10  ;;  %vm4395_vm4 = vcmp.eq.s32.totalorder %v1621_v1, 1  ;;  %v4408_v1 = vld [vmem:[#allocation2 + $0x4a] sm:$0xff]  ;;  %vm4464_vm10 = vmand %vm4383_vm3, %vm309_vm2 }
 0x114   : > { %v2139_v46 = vmax.f32 %v2123_v11, 0.0  ;;  %v2124_v38 = vadd.f32 %v4354_v53, %v2101_v12  ;;  %v1943_v40 = vadd.f32 %v1927_v29, %v1890_v18  ;;  %v1980_v47 = vmul.f32 %v4238_v60, %v4391_v35 }
 0x115   : > { %v1236_v42 = vsel %vm4366_vm15, %v1217_v19, 0.0  ;;  %v1368_v43 = vsel %vm4376_vm0, %v1349_v21, 0.0  ;;  %v1215_v45 = vmax.f32 %v1206_v51, 0.0  ;;  %v1347_v14 = vmax.f32 %v1338_v24, 0.0  ;;  %v1210_v50 = vpop.f32.mrb[22].mxu0  ;;  %v1342_v55 = vpop.f32.mrb[22].mxu1 }
 0x116   : > { %1240 = vst.msk [vmem:[#allocation2 + $0x90] sm:$0xff] %vm446_vm6, %v1236_v42  ;;  %1372 = vst.msk [vmem:[#allocation2 + $0xa8] sm:$0xff] %vm446_vm6, %v1368_v43  ;;  %v2155_v48 = vmin.f32 %v2139_v46, 6.0  ;;  %v2140_v54 = vmax.f32 %v2124_v38, 0.0  ;;  %v1996_v13 = vadd.f32 %v1980_v47, %v1943_v40  ;;  %v2033_v25 = vmul.f32 %v4279_v27, %v4406_v20  ;;  %v3343_v7 = vpop.f32.mrb[23].mxu0  ;;  %v3354_v3 = vpop.f32.mrb[23].mxu1 }
 0x117   : > { %v1218_v28 = vmin.f32 %v1215_v45, 6.0  ;;  %v1350_v2 = vmin.f32 %v1347_v14, 6.0  ;;  %v1211_v4 = vadd.f32 %v3950_v41, %v1210_v50  ;;  %v1343_v6 = vadd.f32 %v3950_v41, %v1342_v55 }
 0x118   : > { %3385 = vmatprep.mubr.msk.f32.mxu0 %vm446_vm6, %v2155_v48  ;;  %v2156_v49 = vmin.f32 %v2140_v54, 6.0  ;;  %v2049_v9 = vadd.f32 %v2033_v25, %v1996_v13  ;;  %v2086_v10 = vmul.f32 %v4292_v44, %v4408_v1  ;;  %v1716_v11 = vmul.f32 %v4158_v57, %v4203_v33  ;;  %v4488_v33 = vld [vmem:[#allocation2 + $0x50] sm:$0xff] }
 0x119   : > { %v1237_v12 = vsel %vm4269_vm11, %v1218_v28, 0.0  ;;  %v1369_v18 = vsel %vm4285_vm12, %v1350_v2, 0.0  ;;  %v1216_v29 = vmax.f32 %v1211_v4, 0.0  ;;  %v1348_v21 = vmax.f32 %v1343_v6, 0.0  ;;  %v1464_v51 = vpop.f32.mrb[24].mxu0  ;;  %v1596_v24 = vpop.f32.mrb[24].mxu1  ;;  %vm4474_vm11 = vmand %vm4395_vm4, %vm309_vm2 }
 0x11a   : > { %1241 = vst.msk [vmem:[#allocation2 + $0x98] sm:$0xff] %vm446_vm6, %v1237_v12  ;;  %1373 = vst.msk [vmem:[#allocation2 + $0xb0] sm:$0xff] %vm446_vm6, %v1369_v18  ;;  %3386 = vmatmul.mubr.msk.f32.vlgmr.msra.gmra.mrb[30].mxu0 %vm446_vm6, %v2156_v49  ;;  %v2102_v23 = vadd.f32 %v2086_v10, %v2049_v9  ;;  %v1732_v30 = vadd.f32 %v1716_v11, %v4193_v15  ;;  %v1769_v8 = vmul.f32 %v4163_v58, %v4230_v52  ;;  %v3359_v47 = vpop.f32.mrb[25].mxu0  ;;  %v3370_v43 = vpop.f32.mrb[25].mxu1  ;;  %v4526_v28 = vld [vmem:[#allocation2 + $0x60] sm:$0xff] }
 0x11b   : > { %v1822_v46 = vmul.f32 %v4112_v32, %v4313_v5  ;;  %v1219_v38 = vmin.f32 %v1216_v29, 6.0  ;;  %v1351_v40 = vmin.f32 %v1348_v21, 6.0  ;;  %v1465_v61 = vadd.f32 %v3950_v41, %v1464_v51  ;;  %3484 = vmatpush3.bf16.msra.mxu0 %v3853_v34  ;;  %v4501_v47 = vld [vmem:[#allocation2 + $0x51] sm:$0xff]  ;;  %vm4520_vm2 = vmand %vm4383_vm3, %vm314_vm8 }
 0x11c   : > { %v1597_v42 = vadd.f32 %v3950_v41, %v1596_v24  ;;  %v2125_v45 = vadd.f32 %v4354_v53, %v2102_v23  ;;  %v1785_v14 = vadd.f32 %v1769_v8, %v1732_v30  ;;  %v1875_v15 = vmul.f32 %v4172_v62, %v4331_v26  ;;  %3486 = vmatprep.subr.bf16.mxu0 %v3865_v37  ;;  %v4495_v24 = vld [vmem:[#allocation2 + $0x52] sm:$0xff]  ;;  %vm4549_vm12 = vmand %vm4395_vm4, %vm314_vm8 }
 0x11d   : > { %v1238_v52 = vsel %vm4429_vm5, %v1219_v38, 0.0  ;;  %v1370_v50 = vsel %vm4439_vm7, %v1351_v40, 0.0  ;;  %v1478_v55 = vmax.f32 %v1465_v61, 0.0  ;;  %v1469_v25 = vpop.f32.mrb[26].mxu0  ;;  %v1601_v2 = vpop.f32.mrb[26].mxu1  ;;  %v1928_v12 = vmul.f32 %v4177_v63, %v4333_v36 }
 0x11e   : > { %v1610_v54 = vmax.f32 %v1597_v42, 0.0  ;;  %1242 = vst.msk [vmem:[#allocation2 + $0xa0] sm:$0x3] %vm449_vm9, %v1238_v52  ;;  %1374 = vst.msk [vmem:[#allocation2 + $0xb8] sm:$0x3] %vm449_vm9, %v1370_v50  ;;  %v2141_v13 = vmax.f32 %v2125_v45, 0.0  ;;  %v1838_v4 = vadd.f32 %v1822_v46, %v1785_v14  ;;  %v1470_v7 = vadd.f32 %v3950_v41, %v1469_v25 }
 0x11f   : > { %v1481_v6 = vmin.f32 %v1478_v55, 6.0  ;;  %v3362_v49 = vpop.f32.mrb[27].mxu0  ;;  %v1602_v9 = vadd.f32 %v3950_v41, %v1601_v2  ;;  %v3373_v10 = vpop.f32.mrb[27].mxu1  ;;  %3488 = vmatpush3.bf16.msra.mxu0 %v3865_v37  ;;  %v1981_v23 = vmul.f32 %v4238_v60, %v4488_v33  ;;  %v1664_v8 = vmul.f32 %v4107_v31, %v4255_v17 }
 0x120   : > { %v1613_v3 = vmin.f32 %v1610_v54, 6.0  ;;  %v2157_v11 = vmin.f32 %v2141_v13, 6.0  ;;  %v1891_v39 = vadd.f32 %v1875_v15, %v1838_v4  ;;  %3498 = vmatprep.subr.bf16.mxu0 %v3853_v34  ;;  %v1479_v29 = vmax.f32 %v1470_v7, 0.0  ;;  %v4531_v7 = vld [vmem:[#allocation2 + $0x61] sm:$0xff] }
 0x121   : > { %v1500_v18 = vsel %vm4464_vm10, %v1481_v6, 0.0  ;;  %v1611_v21 = vmax.f32 %v1602_v9, 0.0  ;;  %v1474_v30 = vpop.f32.mrb[28].mxu0  ;;  %v1717_v46 = vmul.f32 %v4158_v57, %v4302_v59  ;;  %v1606_v38 = vpop.f32.mrb[28].mxu1  ;;  %v2034_v15 = vmul.f32 %v4279_v27, %v4501_v47 }
 0x122   : > { %v1632_v19 = vsel %vm4474_vm11, %v1613_v3, 0.0  ;;  %1504 = vst.msk [vmem:[#allocation2 + $0xc0] sm:$0xff] %vm446_vm6, %v1500_v18  ;;  %3396 = vmatprep.mubr.msk.f32.mxu1 %vm446_vm6, %v2157_v11  ;;  %v1944_v51 = vadd.f32 %v1928_v12, %v1891_v39  ;;  %v1482_v40 = vmin.f32 %v1479_v29, 6.0  ;;  %v1475_v42 = vadd.f32 %v3950_v41, %v1474_v30  ;;  %v3365_v43 = vpop.f32.mrb[29].mxu0  ;;  %v3376_v45 = vpop.f32.mrb[29].mxu1  ;;  %v4539_v11 = vld [vmem:[#allocation2 + $0x62] sm:$0xff] }
 0x123   : > { %1636 = vst.msk [vmem:[#allocation2 + $0xd8] sm:$0xff] %vm446_vm6, %v1632_v19  ;;  %v1614_v61 = vmin.f32 %v1611_v21, 6.0  ;;  %v1733_v52 = vadd.f32 %v1717_v46, %v1664_v8  ;;  %v1770_v17 = vmul.f32 %v4163_v58, %v4304_v22  ;;  %v2087_v55 = vmul.f32 %v4292_v44, %v4495_v24  ;;  %v4591_v22 = vld [vmem:[#allocation2 + $0x7a] sm:$0xff] }
 0x124   : > { %v1997_v14 = vadd.f32 %v1981_v23, %v1944_v51  ;;  %v1501_v59 = vsel %vm4383_vm3, %v1482_v40, 0.0  ;;  %v1480_v48 = vmax.f32 %v1475_v42, 0.0  ;;  %v1823_v25 = vmul.f32 %v4112_v32, %v4391_v35  ;;  %v4569_v40 = vld [vmem:[#allocation2 + $0x69] sm:$0xff] }
 0x125   : > { %v1633_v50 = vsel %vm4395_vm4, %v1614_v61, 0.0  ;;  %1505 = vst.msk [vmem:[#allocation2 + $0xc8] sm:$0xff] %vm446_vm6, %v1501_v59  ;;  %v1786_v13 = vadd.f32 %v1770_v17, %v1733_v52  ;;  %v1607_v2 = vadd.f32 %v3950_v41, %v1606_v38  ;;  %v1876_v6 = vmul.f32 %v4172_v62, %v4406_v20  ;;  %v4567_v38 = vld [vmem:[#allocation2 + $0x68] sm:$0xff] }
 0x126   : > { %1637 = vst.msk [vmem:[#allocation2 + $0xe0] sm:$0xff] %vm446_vm6, %v1633_v50  ;;  %v2050_v54 = vadd.f32 %v2034_v15, %v1997_v14  ;;  %v1483_v4 = vmin.f32 %v1480_v48, 6.0  ;;  %v1665_v16 = vmul.f32 %v4107_v31, %v4313_v5  ;;  %v1718_v3 = vmul.f32 %v4158_v57, %v4331_v26  ;;  %v4580_v52 = vld [vmem:[#allocation2 + $0x6a] sm:$0xff] }
 0x127   : > { %v1839_v9 = vadd.f32 %v1823_v25, %v1786_v13  ;;  %v1929_v10 = vmul.f32 %v4177_v63, %v4408_v1  ;;  %v1612_v41 = vmax.f32 %v1607_v2, 0.0  ;;  %v1982_v12 = vmul.f32 %v4238_v60, %v4526_v28 }
 0x128   : > { %v2103_v49 = vadd.f32 %v2087_v55, %v2050_v54  ;;  %v1502_v39 = vsel %vm4520_vm2, %v1483_v4, 0.0  ;;  %v1734_v26 = vadd.f32 %v1718_v3, %v1665_v16  ;;  %v1771_v18 = vmul.f32 %v4163_v58, %v4333_v36 }
 0x129   : > { %1506 = vst.msk [vmem:[#allocation2 + $0xd0] sm:$0x3] %vm449_vm9, %v1502_v39  ;;  %v1892_v19 = vadd.f32 %v1876_v6, %v1839_v9  ;;  %v2035_v21 = vmul.f32 %v4279_v27, %v4531_v7  ;;  %v1615_v51 = vmin.f32 %v1612_v41, 6.0  ;;  %v2088_v56 = vmul.f32 %v4292_v44, %v4539_v11  ;;  %v4607_v9 = vld [vmem:[#allocation2 + $0x79] sm:$0xff] }
 0x12a   : > { %v2126_v29 = vadd.f32 %v4354_v53, %v2103_v49  ;;  %v1787_v0 = vadd.f32 %v1771_v18, %v1734_v26  ;;  %v1824_v23 = vmul.f32 %v4112_v32, %v4488_v33  ;;  %v1666_v30 = vmul.f32 %v4107_v31, %v4391_v35 }
 0x12b   : > { %v1945_v8 = vadd.f32 %v1929_v10, %v1892_v19  ;;  %v1634_v46 = vsel %vm4549_vm12, %v1615_v51, 0.0  ;;  %v1719_v61 = vmul.f32 %v4158_v57, %v4406_v20  ;;  %v1877_v43 = vmul.f32 %v4172_v62, %v4501_v47  ;;  %v4623_v51 = vld [vmem:[#allocation2 + $0x80] sm:$0xff] }
 0x12c   : > { %v2142_v36 = vmax.f32 %v2126_v29, 0.0  ;;  %1638 = vst.msk [vmem:[#allocation2 + $0xe8] sm:$0x3] %vm449_vm9, %v1634_v46  ;;  %v1840_v42 = vadd.f32 %v1824_v23, %v1787_v0  ;;  %v1930_v35 = vmul.f32 %v4177_v63, %v4495_v24  ;;  %v1772_v45 = vmul.f32 %v4163_v58, %v4408_v1 }
 0x12d   : > { %v1998_v15 = vadd.f32 %v1982_v12, %v1945_v8  ;;  %v1735_v17 = vadd.f32 %v1719_v61, %v1666_v30  ;;  %v1825_v20 = vmul.f32 %v4112_v32, %v4526_v28  ;;  %v1983_v50 = vmul.f32 %v4238_v60, %v4567_v38  ;;  %v4633_v61 = vld [vmem:[#allocation2 + $0x81] sm:$0xff] }
 0x12e   : > { %v2158_v14 = vmin.f32 %v2142_v36, 6.0  ;;  %v1893_v59 = vadd.f32 %v1877_v43, %v1840_v42  ;;  %v2036_v55 = vmul.f32 %v4279_v27, %v4569_v40  ;;  %v1878_v48 = vmul.f32 %v4172_v62, %v4531_v7 }
 0x12f   : > { %v2051_v1 = vadd.f32 %v2035_v21, %v1998_v15  ;;  %v1788_v54 = vadd.f32 %v1772_v45, %v1735_v17  ;;  %v1667_v13 = vmul.f32 %v4107_v31, %v4488_v33  ;;  %v1720_v25 = vmul.f32 %v4158_v57, %v4501_v47  ;;  %v4605_v33 = vld [vmem:[#allocation2 + $0x78] sm:$0xff]  ;;  %v4642_v17 = vld [vmem:[#allocation2 + $0x90] sm:$0xff] }
 0x130   : > { %3397 = vmatmul.mubr.msk.f32.vlgmr.msra.gmra.mrb[30].mxu1 %vm446_vm6, %v2158_v14  ;;  %v1946_v2 = vadd.f32 %v1930_v35, %v1893_v59  ;;  %v2089_v4 = vmul.f32 %v4292_v44, %v4580_v52  ;;  %v1931_v6 = vmul.f32 %v4177_v63, %v4539_v11  ;;  %v1773_v16 = vmul.f32 %v4163_v58, %v4495_v24 }
 0x131   : > { %3492 = vmatpush3.bf16.msra.mxu1 %v3853_v34  ;;  %v2104_v3 = vadd.f32 %v2088_v56, %v2051_v1  ;;  %v1841_v49 = vadd.f32 %v1825_v20, %v1788_v54  ;;  %v1736_v47 = vadd.f32 %v1720_v25, %v1667_v13  ;;  %v1826_v10 = vmul.f32 %v4112_v32, %v4567_v38  ;;  %v4625_v56 = vld [vmem:[#allocation2 + $0x82] sm:$0xff]  ;;  %v4650_v1 = vld [vmem:[#allocation2 + $0x91] sm:$0xff] }
 0x132   : > { %3494 = vmatprep.subr.bf16.mxu1 %v3865_v37  ;;  %v1999_v41 = vadd.f32 %v1983_v50, %v1946_v2  ;;  %v1984_v39 = vmul.f32 %v4238_v60, %v4605_v33  ;;  %v2037_v12 = vmul.f32 %v4279_v27, %v4607_v9  ;;  %v2090_v24 = vmul.f32 %v4292_v44, %v4591_v22  ;;  %v4652_v54 = vld [vmem:[#allocation2 + $0x92] sm:$0xff] }
 0x133   : > { %v2127_v5 = vadd.f32 %v4354_v53, %v2104_v3  ;;  %v1894_v26 = vadd.f32 %v1878_v48, %v1841_v49  ;;  %v1789_v18 = vadd.f32 %v1773_v16, %v1736_v47  ;;  %v1879_v29 = vmul.f32 %v4172_v62, %v4569_v40 }
 0x134   : > { %v2052_v19 = vadd.f32 %v2036_v55, %v1999_v41  ;;  %v1932_v21 = vmul.f32 %v4177_v63, %v4580_v52  ;;  %v1668_v0 = vmul.f32 %v4107_v31, %v4526_v28  ;;  %v1721_v23 = vmul.f32 %v4158_v57, %v4531_v7 }
 0x135   : > { %3496 = vmatpush3.bf16.msra.mxu1 %v3865_v37  ;;  %v2143_v30 = vmax.f32 %v2127_v5, 0.0  ;;  %v1947_v36 = vadd.f32 %v1931_v6, %v1894_v26  ;;  %v1842_v8 = vadd.f32 %v1826_v10, %v1789_v18  ;;  %v1985_v46 = vmul.f32 %v4238_v60, %v4623_v51 }
 0x136   : > { %3506 = vmatprep.subr.bf16.mxu1 %v3853_v34  ;;  %v2105_v42 = vadd.f32 %v2089_v4, %v2052_v19  ;;  %v2038_v43 = vmul.f32 %v4279_v27, %v4633_v61  ;;  %v1737_v35 = vadd.f32 %v1721_v23, %v1668_v0  ;;  %v1774_v28 = vmul.f32 %v4163_v58, %v4539_v11 }
 0x137   : > { %v2159_v45 = vmin.f32 %v2143_v30, 6.0  ;;  %v2000_v7 = vadd.f32 %v1984_v39, %v1947_v36  ;;  %v1895_v14 = vadd.f32 %v1879_v29, %v1842_v8  ;;  %v2091_v15 = vmul.f32 %v4292_v44, %v4625_v56  ;;  %v4672_v29 = vld [vmem:[#allocation2 + $0x98] sm:$0xff] }
 0x138   : > { %v2128_v20 = vadd.f32 %v4354_v53, %v2105_v42  ;;  %v1790_v59 = vadd.f32 %v1774_v28, %v1737_v35  ;;  %v1827_v50 = vmul.f32 %v4112_v32, %v4605_v33  ;;  %v1880_v55 = vmul.f32 %v4172_v62, %v4607_v9  ;;  %v4683_v8 = vld [vmem:[#allocation2 + $0x99] sm:$0xff] }
 0x139   : > { %3407 = vmatprep.mubr.msk.f32.mxu0 %vm446_vm6, %v2159_v45  ;;  %v2053_v11 = vadd.f32 %v2037_v12, %v2000_v7  ;;  %v1948_v48 = vadd.f32 %v1932_v21, %v1895_v14  ;;  %v1669_v13 = vmul.f32 %v4107_v31, %v4567_v38  ;;  %v1722_v25 = vmul.f32 %v4158_v57, %v4569_v40  ;;  %v4693_v45 = vld [vmem:[#allocation2 + $0x9a] sm:$0xff] }
 0x13a   : > { %v2144_v2 = vmax.f32 %v2128_v20, 0.0  ;;  %v1843_v4 = vadd.f32 %v1827_v50, %v1790_v59  ;;  %v1933_v6 = vmul.f32 %v4177_v63, %v4591_v22  ;;  %v1986_v16 = vmul.f32 %v4238_v60, %v4642_v17 }
 0x13b   : > { %v2106_v3 = vadd.f32 %v2090_v24, %v2053_v11  ;;  %v2001_v49 = vadd.f32 %v1985_v46, %v1948_v48  ;;  %v1738_v47 = vadd.f32 %v1722_v25, %v1669_v13  ;;  %v1775_v10 = vmul.f32 %v4163_v58, %v4580_v52 }
 0x13c   : > { %v2160_v41 = vmin.f32 %v2144_v2, 6.0  ;;  %v1896_v39 = vadd.f32 %v1880_v55, %v1843_v4  ;;  %v2039_v38 = vmul.f32 %v4279_v27, %v4650_v1  ;;  %v2092_v40 = vmul.f32 %v4292_v44, %v4652_v54 }
 0x13d   : > { %v2129_v12 = vadd.f32 %v4354_v53, %v2106_v3  ;;  %v2054_v5 = vadd.f32 %v2038_v43, %v2001_v49  ;;  %v1791_v26 = vadd.f32 %v1775_v10, %v1738_v47  ;;  %v1828_v24 = vmul.f32 %v4112_v32, %v4623_v51 }
 0x13e   : > { %3408 = vmatmul.mubr.msk.f32.vlgmr.msra.gmra.mrb[32].mxu0 %vm446_vm6, %v2160_v41  ;;  %v1949_v18 = vadd.f32 %v1933_v6, %v1896_v39  ;;  %v1670_v52 = vmul.f32 %v4107_v31, %v4605_v33  ;;  %v1723_v19 = vmul.f32 %v4158_v57, %v4607_v9  ;;  %v1776_v21 = vmul.f32 %v4163_v58, %v4591_v22  ;;  %v4719_v41 = vld [vmem:[#allocation2 + $0xa9] sm:$0xff] }
 0x13f   : > { %v2145_v0 = vmax.f32 %v2129_v12, 0.0  ;;  %3500 = vmatpush3.bf16.msra.mxu0 %v3853_v34  ;;  %v2107_v23 = vadd.f32 %v2091_v15, %v2054_v5  ;;  %v1844_v30 = vadd.f32 %v1828_v24, %v1791_v26  ;;  %v1881_v36 = vmul.f32 %v4172_v62, %v4633_v61 }
 0x140   : > { %3502 = vmatprep.subr.bf16.mxu0 %v3865_v37  ;;  %v2002_v46 = vadd.f32 %v1986_v16, %v1949_v18  ;;  %v1934_v33 = vmul.f32 %v4177_v63, %v4625_v56  ;;  %v1739_v9 = vadd.f32 %v1723_v19, %v1670_v52  ;;  %v1829_v22 = vmul.f32 %v4112_v32, %v4642_v17  ;;  %v4710_v16 = vld [vmem:[#allocation2 + $0xa8] sm:$0xff] }
 0x141   : > { %v2161_v42 = vmin.f32 %v2145_v0, 6.0  ;;  %v2130_v43 = vadd.f32 %v4354_v53, %v2107_v23  ;;  %v1897_v35 = vadd.f32 %v1881_v36, %v1844_v30  ;;  %v1987_v28 = vmul.f32 %v4238_v60, %v4672_v29  ;;  %v4738_v36 = vld [vmem:[#allocation2 + $0xb0] sm:$0xff] }
 0x142   : > { %v2055_v7 = vadd.f32 %v2039_v38, %v2002_v46  ;;  %v2040_v14 = vmul.f32 %v4279_v27, %v4683_v8  ;;  %v1792_v15 = vadd.f32 %v1776_v21, %v1739_v9  ;;  %v1882_v20 = vmul.f32 %v4172_v62, %v4650_v1  ;;  %v4740_v46 = vld [vmem:[#allocation2 + $0xb1] sm:$0xff] }
 0x143   : > { %3418 = vmatprep.mubr.msk.f32.mxu1 %vm446_vm6, %v2161_v42  ;;  %v2146_v59 = vmax.f32 %v2130_v43, 0.0  ;;  %3504 = vmatpush3.bf16.msra.mxu0 %v3865_v37  ;;  %v1950_v50 = vadd.f32 %v1934_v33, %v1897_v35  ;;  %v1671_v55 = vmul.f32 %v4107_v31, %v4623_v51  ;;  %v1724_v11 = vmul.f32 %v4158_v57, %v4633_v61 }
 0x144   : > { %v2108_v48 = vadd.f32 %v2092_v40, %v2055_v7  ;;  %v2093_v13 = vmul.f32 %v4292_v44, %v4693_v45  ;;  %v1845_v25 = vadd.f32 %v1829_v22, %v1792_v15  ;;  %3514 = vmatprep.subr.bf16.mxu0 %v3853_v34  ;;  %v1777_v2 = vmul.f32 %v4163_v58, %v4625_v56  ;;  %v4721_v56 = vld [vmem:[#allocation2 + $0xaa] sm:$0xff]  ;;  %v1969_v7 = vld [vmem:[#allocation2 + $0xc0] sm:$0xff] }
 0x145   : > { %v2162_v4 = vmin.f32 %v2146_v59, 6.0  ;;  %v2003_v6 = vadd.f32 %v1987_v28, %v1950_v50  ;;  %v1740_v3 = vadd.f32 %v1724_v11, %v1671_v55  ;;  %v1830_v51 = vmul.f32 %v4112_v32, %v4672_v29  ;;  %v2022_v55 = vld [vmem:[#allocation2 + $0xc1] sm:$0xff] }
 0x146   : > { %v2131_v61 = vadd.f32 %v4354_v53, %v2108_v48  ;;  %v1898_v49 = vadd.f32 %v1882_v20, %v1845_v25  ;;  %v1935_v47 = vmul.f32 %v4177_v63, %v4652_v54  ;;  %v1988_v10 = vmul.f32 %v4238_v60, %v4710_v16  ;;  %v4760_v11 = vld [vmem:[#allocation2 + $0xc2] sm:$0xff] }
 0x147   : > { %3419 = vmatmul.mubr.msk.f32.vlgmr.msra.gmra.mrb[32].mxu1 %vm446_vm6, %v2162_v4  ;;  %v2056_v39 = vadd.f32 %v2040_v14, %v2003_v6  ;;  %v2041_v38 = vmul.f32 %v4279_v27, %v4719_v41  ;;  %v1793_v40 = vadd.f32 %v1777_v2, %v1740_v3  ;;  %v1883_v12 = vmul.f32 %v4172_v62, %v4683_v8 }
 0x148   : > { %v2147_v5 = vmax.f32 %v2131_v61, 0.0  ;;  %3508 = vmatpush3.bf16.msra.mxu1 %v3853_v34  ;;  %v1951_v26 = vadd.f32 %v1935_v47, %v1898_v49  ;;  %v1672_v24 = vmul.f32 %v4107_v31, %v4642_v17  ;;  %v1725_v18 = vmul.f32 %v4158_v57, %v4650_v1  ;;  %v4742_v31 = vld [vmem:[#allocation2 + $0xb2] sm:$0xff] }
 0x149   : > { %v2109_v52 = vadd.f32 %v2093_v13, %v2056_v39  ;;  %3510 = vmatprep.subr.bf16.mxu1 %v3865_v37  ;;  %v2094_v19 = vmul.f32 %v4292_v44, %v4721_v56  ;;  %v1846_v21 = vadd.f32 %v1830_v51, %v1793_v40  ;;  %v1936_v0 = vmul.f32 %v4177_v63, %v4693_v45 }
 0x14a   : > { %v2163_v23 = vmin.f32 %v2147_v5, 6.0  ;;  %v2004_v30 = vadd.f32 %v1988_v10, %v1951_v26  ;;  %v1741_v17 = vadd.f32 %v1725_v18, %v1672_v24  ;;  %v1778_v1 = vmul.f32 %v4163_v58, %v4652_v54  ;;  %v2023_v5 = vld [vmem:[#allocation2 + $0xc9] sm:$0xff]  ;;  %v3574_v26 = vld [vmem:[%s4927_s3 + $0x1] ss:$0 sm:$0xff]  ;;  %v3575_v18 = vld [vmem:[%s4927_s3 + $0x2] ss:$0 sm:$0xff] }
 0x14b   : > { %v2132_v33 = vadd.f32 %v4354_v53, %v2109_v52  ;;  %v1899_v9 = vadd.f32 %v1883_v12, %v1846_v21  ;;  %v1989_v22 = vmul.f32 %v4238_v60, %v4738_v36  ;;  %v2042_v42 = vmul.f32 %v4279_v27, %v4740_v46 }
 0x14c   : > { %3429 = vmatprep.mubr.msk.f32.mxu0 %vm446_vm6, %v2163_v23  ;;  %v2057_v43 = vadd.f32 %v2041_v38, %v2004_v30  ;;  %3512 = vmatpush3.bf16.msra.mxu1 %v3865_v37  ;;  %v1794_v35 = vadd.f32 %v1778_v1, %v1741_v17  ;;  %v1831_v28 = vmul.f32 %v4112_v32, %v4710_v16  ;;  %v3572_v32 = vld [vmem:[%s4927_s3] ss:$0 sm:$0xff] }
 0x14d   : > { %v2148_v54 = vmax.f32 %v2132_v33, 0.0  ;;  %v1952_v14 = vadd.f32 %v1936_v0, %v1899_v9  ;;  %v2095_v15 = vmul.f32 %v4292_v44, %v4742_v31  ;;  %v1884_v20 = vmul.f32 %v4172_v62, %v4719_v41  ;;  %3522 = vmatprep.subr.bf16.mxu1 %v3853_v34 }
 0x14e   : > { %v2110_v59 = vadd.f32 %v2094_v19, %v2057_v43  ;;  %v1847_v50 = vadd.f32 %v1831_v28, %v1794_v35  ;;  %v1673_v48 = vmul.f32 %v3572_v32, %v4672_v29  ;;  %v1726_v13 = vmul.f32 %v4158_v57, %v4683_v8 }
 0x14f   : > { %v2164_v25 = vmin.f32 %v2148_v54, 6.0  ;;  %v2005_v2 = vadd.f32 %v1989_v22, %v1952_v14  ;;  %v1937_v4 = vmul.f32 %v4177_v63, %v4721_v56  ;;  %v1990_v6 = vmul.f32 %v4238_v60, %v1969_v7  ;;  %v3573_v63 = vld [vmem:[%s4927_s3 + $0x3] ss:$0 sm:$0xff] }
 0x150   : > { %v2133_v3 = vadd.f32 %v4354_v53, %v2110_v59  ;;  %v1900_v51 = vadd.f32 %v1884_v20, %v1847_v50  ;;  %v1742_v61 = vadd.f32 %v1726_v13, %v1673_v48  ;;  %v1779_v49 = vmul.f32 %v4163_v58, %v4693_v45  ;;  %v1970_v58 = vld [vmem:[#allocation2 + $0xc8] sm:$0xff]  ;;  %v1971_v13 = vld [vmem:[#allocation2 + $0xd8] sm:$0xff] }
 0x151   : > { %3430 = vmatmul.mubr.msk.f32.vlgmr.msra.gmra.mrb[34].mxu0 %vm446_vm6, %v2164_v25  ;;  %v2058_v29 = vadd.f32 %v2042_v42, %v2005_v2  ;;  %v2043_v47 = vmul.f32 %v4279_v27, %v2022_v55  ;;  %v2096_v57 = vmul.f32 %v4292_v44, %v4760_v11  ;;  %v1832_v8 = vmul.f32 %v3573_v63, %v4738_v36  ;;  %v3577_v42 = vld [vmem:[%s4927_s3 + $0x4] ss:$0 sm:$0xff] }
 0x152   : > { %v2149_v10 = vmax.f32 %v2133_v3, 0.0  ;;  %3516 = vmatpush3.bf16.msra.mxu0 %v3853_v34  ;;  %v1953_v39 = vadd.f32 %v1937_v4, %v1900_v51  ;;  %v1795_v38 = vadd.f32 %v1779_v49, %v1742_v61  ;;  %v1674_v45 = vmul.f32 %v3572_v32, %v4710_v16 }
 0x153   : > { %v2111_v40 = vadd.f32 %v2095_v15, %v2058_v29  ;;  %3518 = vmatprep.subr.bf16.mxu0 %v3865_v37  ;;  %v1885_v12 = vmul.f32 %v4172_v62, %v4740_v46  ;;  %v1727_v24 = vmul.f32 %v3574_v26, %v4719_v41  ;;  %v1780_v52 = vmul.f32 %v3575_v18, %v4721_v56  ;;  %v3576_v62 = vld [vmem:[%s4927_s3 + $0x5] ss:$0 sm:$0xff] }
 0x154   : > { %v2165_v16 = vmin.f32 %v2149_v10, 6.0  ;;  %v2006_v19 = vadd.f32 %v1990_v6, %v1953_v39  ;;  %v1848_v21 = vadd.f32 %v1832_v8, %v1795_v38  ;;  %v1938_v0 = vmul.f32 %v3576_v62, %v4742_v31 }
 0x155   : > { %v2134_v23 = vadd.f32 %v4354_v53, %v2111_v40  ;;  %v1991_v30 = vmul.f32 %v4238_v60, %v1970_v58  ;;  %v1743_v41 = vadd.f32 %v1727_v24, %v1674_v45  ;;  %v1833_v17 = vmul.f32 %v3573_v63, %v1969_v7  ;;  %v2076_v7 = vld [vmem:[#allocation2 + $0xca] sm:$0xff]  ;;  %v2078_v24 = vld [vmem:[#allocation2 + $0xe2] sm:$0xff] }
 0x156   : > { %3440 = vmatprep.mubr.msk.f32.mxu1 %vm446_vm6, %v2165_v16  ;;  %v2059_v1 = vadd.f32 %v2043_v47, %v2006_v19  ;;  %3520 = vmatpush3.bf16.msra.mxu0 %v3865_v37  ;;  %v1901_v56 = vadd.f32 %v1885_v12, %v1848_v21  ;;  %v2044_v33 = vmul.f32 %v4279_v27, %v2023_v5  ;;  %v2077_v47 = vld [vmem:[#allocation2 + $0xda] sm:$0xff]  ;;  %v3578_v12 = vld [vmem:[%s4927_s3 + $0x6] ss:$0 sm:$0xff] }
 0x157   : > { %v2150_v9 = vmax.f32 %v2134_v23, 0.0  ;;  %v1796_v22 = vadd.f32 %v1780_v52, %v1743_v41  ;;  %v1886_v43 = vmul.f32 %v3577_v42, %v2022_v55  ;;  %v1675_v35 = vmul.f32 %v3572_v32, %v4738_v36 }
 0x158   : > { %v2112_v28 = vadd.f32 %v2096_v57, %v2059_v1  ;;  %v1954_v54 = vadd.f32 %v1938_v0, %v1901_v56  ;;  %v1728_v14 = vmul.f32 %v3574_v26, %v4740_v46  ;;  %v1781_v15 = vmul.f32 %v3575_v18, %v4742_v31  ;;  %v2024_v31 = vld [vmem:[#allocation2 + $0xd9] sm:$0xff] }
 0x159   : > { %v2166_v20 = vmin.f32 %v2150_v9, 6.0  ;;  %v1849_v59 = vadd.f32 %v1833_v17, %v1796_v22  ;;  %v1834_v2 = vmul.f32 %v3573_v63, %v1970_v58  ;;  %v2097_v55 = vmul.f32 %v4292_v44, %v2076_v7 }
 0x15a   : > { %v2135_v50 = vadd.f32 %v4354_v53, %v2112_v28  ;;  %v2007_v48 = vadd.f32 %v1991_v30, %v1954_v54  ;;  %v1744_v25 = vadd.f32 %v1728_v14, %v1675_v35  ;;  %v1939_v32 = vmul.f32 %v3576_v62, %v4760_v11  ;;  %v1972_v11 = vld [vmem:[#allocation2 + $0xe0] sm:$0xff] }
 0x15b   : > { %3441 = vmatmul.mubr.msk.f32.vlgmr.msra.gmra.mrb[34].mxu1 %vm446_vm6, %v2166_v20  ;;  %v1902_v36 = vadd.f32 %v1886_v43, %v1849_v59  ;;  %v1887_v3 = vmul.f32 %v3577_v42, %v2023_v5  ;;  %v1992_v61 = vmul.f32 %v4238_v60, %v1971_v13  ;;  %v2045_v8 = vmul.f32 %v4279_v27, %v2024_v31  ;;  %v2025_v60 = vld [vmem:[#allocation2 + $0xe1] sm:$0xff]  ;;  %v3138_v35 = vld [vmem:[%s3715_s15 + $0x39] sm:$0xff] }
 0x15c   : > { %v2151_v4 = vmax.f32 %v2135_v50, 0.0  ;;  %3524 = vmatpush3.bf16.msra.mxu1 %v3853_v34  ;;  %v2060_v46 = vadd.f32 %v2044_v33, %v2007_v48  ;;  %v1797_v6 = vadd.f32 %v1781_v15, %v1744_v25  ;;  %v1940_v39 = vmul.f32 %v3576_v62, %v2076_v7  ;;  %v3133_v33 = vld [vmem:[%s3715_s15 + $0x19] sm:$0xff]  ;;  %v3137_v7 = vld [vmem:[%s3715_s15 + $0x31] sm:$0xff]  ;;  %v3143_v25 = vld [vmem:[%s3715_s15 + $0x49] sm:$0xff] }
 0x15d   : > { %3526 = vmatprep.subr.bf16.mxu1 %v3865_v37  ;;  %v1955_v51 = vadd.f32 %v1939_v32, %v1902_v36  ;;  %v2098_v58 = vmul.f32 %v4292_v44, %v2077_v47  ;;  %v1993_v5 = vmul.f32 %v3578_v12, %v1972_v11  ;;  %v2099_v21 = vmul.f32 %v4292_v44, %v2078_v24  ;;  %v3144_v50 = vld [vmem:[%s3715_s15 + $0x51] sm:$0xff] }
 0x15e   : > { %v2167_v49 = vmin.f32 %v2151_v4, 6.0  ;;  %v2113_v29 = vadd.f32 %v2097_v55, %v2060_v46  ;;  %v1850_v57 = vadd.f32 %v1834_v2, %v1797_v6  ;;  %v3150_v4 = vld [vmem:[%s3715_s15 + $0x69] sm:$0xff]  ;;  %v3149_v6 = vld [vmem:[%s3715_s15 + $0x61] sm:$0xff] }
 0x15f   : > { %v2008_v63 = vadd.f32 %v1992_v61, %v1955_v51 }
 0x160   : > { %3451 = vmatprep.mubr.msk.f32.mxu0 %vm446_vm6, %v2167_v49  ;;  %v2136_v34 = vadd.f32 %v4354_v53, %v2113_v29  ;;  %3528 = vmatpush3.bf16.msra.mxu1 %v3865_v37  ;;  %v1903_v10 = vadd.f32 %v1887_v3, %v1850_v57  ;;  %v2046_v37 = vmul.f32 %v4279_v27, %v2025_v60  ;;  %v4838_v27 = vld [vmem:[%s4930_s6] ss:$0 sm:$0xff]  ;;  %v3156_v29 = vld [vmem:[%s3715_s15 + $0x81] sm:$0xff]  ;;  %v3161_v60 = vld [vmem:[%s3715_s15 + $0x91] sm:$0xff] }
 0x161   : > { %v2061_v38 = vadd.f32 %v2045_v8, %v2008_v63  ;;  %v3155_v63 = vld [vmem:[%s3715_s15 + $0x79] sm:$0xff] }
 0x162   : > { %v2152_v45 = vmax.f32 %v2136_v34, 0.0  ;;  %v1956_v40 = vadd.f32 %v1940_v39, %v1903_v10  ;;  %v3162_v39 = vld [vmem:[%s3715_s15 + $0x99] sm:$0xff] }
 0x163   : > { %v2114_v26 = vadd.f32 %v2098_v58, %v2061_v38 }
 0x164   : > { %v2168_v18 = vmin.f32 %v2152_v45, 6.0  ;;  %v2009_v52 = vadd.f32 %v1993_v5, %v1956_v40 }
 0x165   : > { %v2137_v16 = vadd.f32 %v4354_v53, %v2114_v26  ;;  %v3168_v26 = vld [vmem:[%s3715_s15 + $0xb1] sm:$0xff] }
 0x166   : > { %3452 = vmatmul.mubr.msk.f32.vlgmr.msra.gmra.mrb[36].mxu0 %vm446_vm6, %v2168_v18  ;;  %v2062_v19 = vadd.f32 %v2046_v37, %v2009_v52  ;;  %v3167_v52 = vld [vmem:[%s3715_s15 + $0xa9] sm:$0xff] }
 0x167   : > { %v2153_v62 = vmax.f32 %v2137_v16, 0.0 }
 0x168   : > { %v2115_v0 = vadd.f32 %v2099_v21, %v2062_v19 }
 0x169   : > { %v2169_v23 = vmin.f32 %v2153_v62, 6.0  ;;  %v3174_v62 = vld [vmem:[%s3715_s15 + $0xc9] sm:$0xff] }
 0x16a   : > { %v2138_v30 = vadd.f32 %v4354_v53, %v2115_v0  ;;  %v3134_v53 = vld [vmem:[%s3715_s15 + $0x21] sm:$0xff] }
 0x16b   : > { %3462 = vmatprep.mubr.msk.f32.mxu1 %vm446_vm6, %v2169_v23 }
 0x16c   : > { %v2154_v41 = vmax.f32 %v2138_v30, 0.0  ;;  %v3173_v30 = vld [vmem:[%s3715_s15 + $0xc1] sm:$0xff] }
 0x16e   : > { %v2170_v17 = vmin.f32 %v2154_v41, 6.0 }
 0x170   : > { %3463 = vmatmul.mubr.msk.f32.vlgmr.msra.gmra.mrb[36].mxu1 %vm446_vm6, %v2170_v17 }
 0x1ed   : > { %v3387_v44 = vpop.f32.mrb[30].mxu0 }
 0x1ee   : > { %v2260_v1 = vadd.f32 %v3387_v44, %v4838_v27  ;;  %v2254_v56 = vpop.f32.mrb[31].mxu0 }
 0x1ef   : > { %v2255_v9 = vadd.f32 %v4838_v27, %v2254_v56 }
 0x1f0   : > { %v2266_v22 = vadd.f32 %v3134_v53, %v2260_v1 }
 0x1f1   : > { %v2265_v42 = vadd.f32 %v3133_v33, %v2255_v9 }
 0x1f2   : > { %2268 = vst.msk [vmem:[%s4846_s8 + $0x8] sm:$0xff] %vm331_vm1, %v2266_v22 }
 0x1f3   : > { %2267 = vst.msk [vmem:[%s4846_s8] sm:$0xff] %vm331_vm1, %v2265_v42 }
 0x203   : > { %v3398_v43 = vpop.f32.mrb[30].mxu1 }
 0x204   : > { %v2347_v28 = vadd.f32 %v3398_v43, %v4838_v27  ;;  %v2341_v54 = vpop.f32.mrb[31].mxu1 }
 0x205   : > { %v2342_v14 = vadd.f32 %v4838_v27, %v2341_v54 }
 0x206   : > { %v2353_v15 = vadd.f32 %v3138_v35, %v2347_v28 }
 0x207   : > { %v2352_v20 = vadd.f32 %v3137_v7, %v2342_v14 }
 0x208   : > { %3140 = vst.msk [vmem:[%s4846_s8 + $0x18] sm:$0xff] %vm331_vm1, %v2353_v15 }
 0x209   : > { %3139 = vst.msk [vmem:[%s4846_s8 + $0x10] sm:$0xff] %vm331_vm1, %v2352_v20 }
 0x211   : > { %v3409_v59 = vpop.f32.mrb[32].mxu0 }
 0x212   : > { %v2435_v48 = vadd.f32 %v3409_v59, %v4838_v27  ;;  %v2429_v13 = vpop.f32.mrb[33].mxu0 }
 0x213   : > { %v2430_v2 = vadd.f32 %v4838_v27, %v2429_v13 }
 0x214   : > { %v2441_v55 = vadd.f32 %v3144_v50, %v2435_v48 }
 0x215   : > { %v2440_v36 = vadd.f32 %v3143_v25, %v2430_v2 }
 0x216   : > { %3146 = vst.msk [vmem:[%s4846_s8 + $0x28] sm:$0xff] %vm331_vm1, %v2441_v55 }
 0x217   : > { %3145 = vst.msk [vmem:[%s4846_s8 + $0x20] sm:$0xff] %vm331_vm1, %v2440_v36 }
 0x21a   : > { %v3420_v32 = vpop.f32.mrb[32].mxu1 }
 0x21b   : > { %v2523_v46 = vadd.f32 %v3420_v32, %v4838_v27  ;;  %v2517_v31 = vpop.f32.mrb[33].mxu1 }
 0x21c   : > { %v2518_v3 = vadd.f32 %v4838_v27, %v2517_v31 }
 0x21d   : > { %v2529_v51 = vadd.f32 %v3150_v4, %v2523_v46 }
 0x21e   : > { %v2528_v61 = vadd.f32 %v3149_v6, %v2518_v3 }
 0x21f   : > { %3152 = vst.msk [vmem:[%s4846_s8 + $0x38] sm:$0xff] %vm331_vm1, %v2529_v51 }
 0x220   : > { %3151 = vst.msk [vmem:[%s4846_s8 + $0x30] sm:$0xff] %vm331_vm1, %v2528_v61 }
 0x224   : > { %v3431_v49 = vpop.f32.mrb[34].mxu0 }
 0x225   : > { %v2611_v47 = vadd.f32 %v3431_v49, %v4838_v27  ;;  %v2605_v57 = vpop.f32.mrb[35].mxu0 }
 0x226   : > { %v2606_v8 = vadd.f32 %v4838_v27, %v2605_v57 }
 0x227   : > { %v2617_v11 = vadd.f32 %v3156_v29, %v2611_v47 }
 0x228   : > { %v2616_v34 = vadd.f32 %v3155_v63, %v2606_v8 }
 0x229   : > { %3158 = vst.msk [vmem:[%s4846_s8 + $0x48] sm:$0xff] %vm331_vm1, %v2617_v11 }
 0x22a   : > { %3157 = vst.msk [vmem:[%s4846_s8 + $0x40] sm:$0xff] %vm331_vm1, %v2616_v34 }
 0x22e   : > { %v3442_v10 = vpop.f32.mrb[34].mxu1 }
 0x22f   : > { %v2699_v38 = vadd.f32 %v3442_v10, %v4838_v27  ;;  %v2693_v58 = vpop.f32.mrb[35].mxu1 }
 0x230   : > { %v2694_v45 = vadd.f32 %v4838_v27, %v2693_v58 }
 0x231   : > { %v2705_v40 = vadd.f32 %v3162_v39, %v2699_v38 }
 0x232   : > { %v2704_v12 = vadd.f32 %v3161_v60, %v2694_v45 }
 0x233   : > { %3164 = vst.msk [vmem:[%s4846_s8 + $0x58] sm:$0xff] %vm331_vm1, %v2705_v40 }
 0x234   : > { %3163 = vst.msk [vmem:[%s4846_s8 + $0x50] sm:$0xff] %vm331_vm1, %v2704_v12 }
 0x239   : > { %v3453_v5 = vpop.f32.mrb[36].mxu0 }
 0x23a   : > { %v2787_v24 = vadd.f32 %v3453_v5, %v4838_v27  ;;  %v2781_v18 = vpop.f32.mrb[37].mxu0 }
 0x23b   : > { %v2782_v37 = vadd.f32 %v4838_v27, %v2781_v18 }
 0x23c   : > { %v2793_v16 = vadd.f32 %v3168_v26, %v2787_v24 }
 0x23d   : > { %v2792_v19 = vadd.f32 %v3167_v52, %v2782_v37 }
 0x23e   : > { %3170 = vst.msk [vmem:[%s4846_s8 + $0x68] sm:$0xff] %vm331_vm1, %v2793_v16 }
 0x23f   : > { %3169 = vst.msk [vmem:[%s4846_s8 + $0x60] sm:$0xff] %vm331_vm1, %v2792_v19 }
 0x243   : > { %v3464_v21 = vpop.f32.mrb[36].mxu1 }
 0x244   : > { %v2875_v0 = vadd.f32 %v3464_v21, %v4838_v27  ;;  %v2869_v23 = vpop.f32.mrb[37].mxu1 }
 0x245   : > { %v2870_v41 = vadd.f32 %v4838_v27, %v2869_v23 }
 0x246   : > { %v2881_v17 = vadd.f32 %v3174_v62, %v2875_v0 }
 0x247   : > { %v2880_v44 = vadd.f32 %v3173_v30, %v2870_v41 }
 0x248   : > { %3176 = vst.msk [vmem:[%s4846_s8 + $0x78] sm:$0xff] %vm331_vm1, %v2881_v17 }
 0x249   : > { %3175 = vst.msk [vmem:[%s4846_s8 + $0x70] sm:$0xff] %vm331_vm1, %v2880_v44 }
 0x24a PF: > { %s17_s28 = sadd.s32 1, %s3617_s28   ;;  %s5007_s24 = smov %s3609_s26 }
 0x24b   : > { %p14_p9 = scmp.ge.s32.totalorder %s17_s28, 6   ;;  %s5008_s25 = smov %s3613_s27 }
 0x24c   : > { %s5009_s26 = smov %s5012_s29  ;;  %s5010_s27 = smov %s5016_s30 }
 0x24d   :  { %16 = sbr.rel (!%p14_p9) target bundleno = 3 (0x3), region = 104 }

</bundles_post_ra>
